<compile_context>
chip_gen: v7x
topology: tpu7x:2x2x1
jax: 0.10.0
libtpu: 0.0.40
codegen_flags: <defaults>
</compile_context>

<pallas_src>
import math

import jax
import jax.numpy as jnp
from jax.experimental import pallas as pl
from jax.experimental.pallas import tpu as pltpu

# ---- "conf" -----------------------------------------------------------------
HIDDEN = 32
N_HEADS = 2
HEAD_DIM = HIDDEN // N_HEADS
FFN = 64
CHAR_LAYERS = 1           # conf.char_layer
CHAR_LATTICE_LAYERS = 1   # conf.char_lattice_layer
N_LAYERS = 2 * CHAR_LAYERS + CHAR_LATTICE_LAYERS
LN_EPS = 1e-5
_NEG = 1e9


# ---- fused Pallas kernel ------------------------------------------------------
def _fused_backbone_kernel(char_ref, lat_ref, kpc_ref, kpl_ref, pos_ref,
                           wqkv_ref, bqkv_ref, wo_ref, bo_ref,
                           w1_ref, b1_ref, w2_ref, b2_ref,
                           lng_ref, lnb_ref, out_ref):
    """One grid step == one batch element; all encoder layers run in VMEM."""
    f32 = jnp.float32
    scale = 1.0 / math.sqrt(HEAD_DIM)

    x = char_ref[0].astype(f32)      # [S_CHAR, HIDDEN]
    lat = lat_ref[0].astype(f32)     # [S_LAT,  HIDDEN]
    kp_char = kpc_ref[0]             # [1, S_CHAR]  additive key-padding term
    kp_lat = kpl_ref[0]              # [1, S_LAT]

    def mm(a, b):
        return jnp.dot(a, b, preferred_element_type=f32)

    def layer_norm(v, l, j):
        g = lng_ref[l * 2 + j]       # [1, HIDDEN]
        b = lnb_ref[l * 2 + j]
        mu = jnp.mean(v, axis=-1, keepdims=True)
        var = jnp.mean(jnp.square(v - mu), axis=-1, keepdims=True)
        return (v - mu) * jax.lax.rsqrt(var + LN_EPS) * g + b

    def encoder_layer(l, x, kv, key_bias, use_pos):
        # ---- multi-head attention (heads statically unrolled) ----
        attn = jnp.zeros((x.shape[0], HIDDEN), f32)
        for h in range(N_HEADS):
            qi = (l * 3 + 0) * N_HEADS + h
            ki = (l * 3 + 1) * N_HEADS + h
            vi = (l * 3 + 2) * N_HEADS + h
            q = mm(x, wqkv_ref[qi]) + bqkv_ref[qi]        # [Sq, D]
            k = mm(kv, wqkv_ref[ki]) + bqkv_ref[ki]       # [Sk, D]
            v = mm(kv, wqkv_ref[vi]) + bqkv_ref[vi]       # [Sk, D]
            # scores: q @ k.T (contraction over the last dims, MXU)
            s = jax.lax.dot_general(q, k, (((1,), (1,)), ((), ())),
                                    preferred_element_type=f32) * scale
            s = s + key_bias                              # [Sq,Sk] + [1,Sk]
            if use_pos:
                s = s + pos_ref[0, h]                     # per-head rel-pos bias
            # numerically-stable softmax; reciprocal rides the EUP slot
            s = s - jnp.max(s, axis=-1, keepdims=True)
            p = jnp.exp(s)
            p = p * pl.reciprocal(jnp.sum(p, axis=-1, keepdims=True), approx=True)
            o = mm(p, v)                                  # [Sq, D]
            attn = attn + mm(o, wo_ref[l * N_HEADS + h])  # per-head out-proj slab
        attn = attn + bo_ref[l]
        # ---- residual + LayerNorm + FFN, all fused in VMEM ----
        x = layer_norm(x + attn, l, 0)
        hdn = jnp.maximum(mm(x, w1_ref[l]) + b1_ref[l], 0.0)
        hdn = mm(hdn, w2_ref[l]) + b2_ref[l]
        return layer_norm(x + hdn, l, 1)

    l = 0
    for _ in range(CHAR_LAYERS):            # self-attention block (char)
        x = encoder_layer(l, x, x, kp_char, use_pos=False)
        l += 1
    for _ in range(CHAR_LATTICE_LAYERS):    # cross-attention block (char x lattice)
        x = encoder_layer(l, x, lat, kp_lat, use_pos=True)
        l += 1
    for _ in range(CHAR_LAYERS):            # self-attention block (char)
        x = encoder_layer(l, x, x, kp_char, use_pos=False)
        l += 1

    out_ref[0] = x.astype(out_ref.dtype)


# ---- weight packing (wrapper-side, done once per call under jit) --------------
def _pack_params(params):
    """Stack per-layer / per-head weight slabs so the kernel only indexes
    leading dimensions of VMEM refs (no in-kernel lane slicing)."""
    layers = (list(params["char_block"]) + list(params["char_lattice"])
              + list(params["char_block1"]))
    hs = lambda t, h: t[..., h * HEAD_DIM:(h + 1) * HEAD_DIM]   # head column slab

    w_qkv = jnp.stack([hs(p[n], h)
                       for p in layers for n in ("wq", "wk", "wv")
                       for h in range(N_HEADS)], 0)              # [L*3*NH, HIDDEN, D]
    b_qkv = jnp.stack([hs(p[n], h)[None, :]
                       for p in layers for n in ("bq", "bk", "bv")
                       for h in range(N_HEADS)], 0)              # [L*3*NH, 1, D]
    w_o = jnp.stack([p["wo"][h * HEAD_DIM:(h + 1) * HEAD_DIM, :]
                     for p in layers for h in range(N_HEADS)], 0)  # [L*NH, D, HIDDEN]
    b_o = jnp.stack([p["bo"][None, :] for p in layers], 0)       # [L, 1, HIDDEN]
    w1 = jnp.stack([p["w1"] for p in layers], 0)                 # [L, HIDDEN, FFN]
    b1 = jnp.stack([p["b1"][None, :] for p in layers], 0)        # [L, 1, FFN]
    w2 = jnp.stack([p["w2"] for p in layers], 0)                 # [L, FFN, HIDDEN]
    b2 = jnp.stack([p["b2"][None, :] for p in layers], 0)        # [L, 1, HIDDEN]
    ln_g = jnp.stack([p[n][None, :] for p in layers
                      for n in ("ln1_g", "ln2_g")], 0)           # [L*2, 1, HIDDEN]
    ln_b = jnp.stack([p[n][None, :] for p in layers
                      for n in ("ln1_b", "ln2_b")], 0)           # [L*2, 1, HIDDEN]
    return (w_qkv, b_qkv, w_o, b_o, w1, b1, w2, b2, ln_g, ln_b)


def _batch_spec(shape):
    tail = tuple(shape[1:])
    zeros = (0,) * len(tail)
    return pl.BlockSpec((1,) + tail, lambda b: (b,) + zeros)


def _replicated_spec(shape):
    zeros = (0,) * len(shape)
    return pl.BlockSpec(tuple(shape), lambda b: zeros)


# ---- fused forward -------------------------------------------------------------
@jax.jit
def flat_lattice_backbone_forward(params, char, lattice, char_mask, lattice_mask,
                                  lattice_pos_emb, char_lattice_pos_emb):
    """self-attn(char) -> cross-attn(char, lattice, +per-head pos bias) -> self-attn."""
    del lattice_pos_emb  # not consumed by this forward path (as in the reference)
    B, Sc, H = char.shape

    packed = _pack_params(params)
    # key-padding masks folded once into additive score terms (0 keep / -1e9 drop)
    kp_char = ((char_mask.astype(jnp.float32) - 1.0) * _NEG)[:, None, :]    # [B,1,Sc]
    kp_lat = ((lattice_mask.astype(jnp.float32) - 1.0) * _NEG)[:, None, :]  # [B,1,Sl]
    # per-head relative-position score bias for the cross-attention block
    pos = jnp.transpose(char_lattice_pos_emb, (0, 3, 1, 2)).astype(jnp.float32)

    data = (char, lattice, kp_char, kp_lat, pos)
    in_specs = ([_batch_spec(a.shape) for a in data]
                + [_replicated_spec(w.shape) for w in packed])

    return pl.pallas_call(
        _fused_backbone_kernel,
        grid=(B,),
        in_specs=in_specs,
        out_specs=pl.BlockSpec((1, Sc, H), lambda b: (b, 0, 0)),
        out_shape=jax.ShapeDtypeStruct((B, Sc, H), char.dtype),
        compiler_params=pltpu.CompilerParams(
            # batch axis shards across v7x's two TensorCores; harmless elsewhere
            dimension_semantics=("parallel",),
            # explicit VMEM budget (comfortably under v7x's 64 MiB physical)
            vmem_limit_bytes=32 * 1024 * 1024,
        ),
    )(*data, *packed)


# ---- pure-JAX reference (validation only) ---------------------------------------
def _ref_forward(params, char, lattice, char_mask, lattice_mask, char_lattice_pos_emb):
    def ln(x, g, b):
        mu = x.mean(-1, keepdims=True)
        var = jnp.square(x - mu).mean(-1, keepdims=True)
        return (x - mu) * jax.lax.rsqrt(var + LN_EPS) * g + b

    def mha(xq, xkv, mask, bias, p):
        B, Sq, H = xq.shape
        Sk = xkv.shape[1]
        q = xq @ p["wq"] + p["bq"]
        k = xkv @ p["wk"] + p["bk"]
        v = xkv @ p["wv"] + p["bv"]
        sh = lambda t, S: t.reshape(B, S, N_HEADS, HEAD_DIM).transpose(0, 2, 1, 3)
        q, k, v = sh(q, Sq), sh(k, Sk), sh(v, Sk)
        s = jnp.einsum("bhqd,bhkd->bhqk", q, k) / math.sqrt(HEAD_DIM)
        if bias is not None:
            s = s + bias
        s = jnp.where(mask[:, None, None, :] > 0, s, -_NEG)
        a = jax.nn.softmax(s, axis=-1)
        o = jnp.einsum("bhqk,bhkd->bhqd", a, v)
        o = o.transpose(0, 2, 1, 3).reshape(B, Sq, H)
        return o @ p["wo"] + p["bo"]

    def enc(x, kv, mask, bias, p):
        x = ln(x + mha(x, kv, mask, bias, p), p["ln1_g"], p["ln1_b"])
        h = jnp.maximum(x @ p["w1"] + p["b1"], 0.0) @ p["w2"] + p["b2"]
        return ln(x + h, p["ln2_g"], p["ln2_b"])

    x = char
    for p in params["char_block"]:
        x = enc(x, x, char_mask, None, p)
    bias = jnp.transpose(char_lattice_pos_emb, (0, 3, 1, 2))
    for p in params["char_lattice"]:
        x = enc(x, lattice, lattice_mask, bias, p)
    for p in params["char_block1"]:
        x = enc(x, x, char_mask, None, p)
    return x


# ---- deterministic parameter init ------------------------------------------------
def init_layer_params(key):
    ks = jax.random.split(key, 6)

    def w(k, shape):
        return jax.random.normal(k, shape, jnp.float32) * 0.02

    z = lambda n: jnp.zeros((n,), jnp.float32)
    return {
        "wq": w(ks[0], (HIDDEN, HIDDEN)), "bq": z(HIDDEN),
        "wk": w(ks[1], (HIDDEN, HIDDEN)), "bk": z(HIDDEN),
        "wv": w(ks[2], (HIDDEN, HIDDEN)), "bv": z(HIDDEN),
        "wo": w(ks[3], (HIDDEN, HIDDEN)), "bo": z(HIDDEN),
        "w1": w(ks[4], (HIDDEN, FFN)),    "b1": z(FFN),
        "w2": w(ks[5], (FFN, HIDDEN)),    "b2": z(HIDDEN),
        "ln1_g": jnp.ones((HIDDEN,), jnp.float32), "ln1_b": z(HIDDEN),
        "ln2_g": jnp.ones((HIDDEN,), jnp.float32), "ln2_b": z(HIDDEN),
    }


def init_params(key):
    k1, k2, k3 = jax.random.split(key, 3)
    return {
        "char_block":   [init_layer_params(k) for k in jax.random.split(k1, CHAR_LAYERS)],
        "char_lattice": [init_layer_params(k) for k in jax.random.split(k2, CHAR_LATTICE_LAYERS)],
        "char_block1":  [init_layer_params(k) for k in jax.random.split(k3, CHAR_LAYERS)],
    }


# ---- main ------------------------------------------------------------------------
if __name__ == "__main__":
    B, S_CHAR, S_LAT = 2, 8, 8

    key = jax.random.PRNGKey(0)
    k_char, k_lat, k_pos1, k_pos2 = jax.random.split(key, 4)

    char = jax.random.normal(k_char, (B, S_CHAR, HIDDEN), jnp.float32)
    lattice = jax.random.normal(k_lat, (B, S_LAT, HIDDEN), jnp.float32)

    char_mask = jnp.ones((B, S_CHAR), jnp.float32).at[1, -2:].set(0.0)
    lattice_mask = jnp.ones((B, S_LAT), jnp.float32).at[1, -3:].set(0.0)

    lattice_pos_emb = jax.random.normal(k_pos1, (B, S_LAT, S_LAT, N_HEADS), jnp.float32)
    char_lattice_pos_emb = jax.random.normal(k_pos2, (B, S_CHAR, S_LAT, N_HEADS), jnp.float32)

    params = init_params(jax.random.PRNGKey(42))

    out = flat_lattice_backbone_forward(params, char, lattice, char_mask,
                                        lattice_mask, lattice_pos_emb,
                                        char_lattice_pos_emb)
    out = jax.block_until_ready(out)
    assert out.shape == (B, S_CHAR, HIDDEN) and out.dtype == jnp.float32

    ref = _ref_forward(params, char, lattice, char_mask, lattice_mask,
                       char_lattice_pos_emb)
    err = float(jnp.max(jnp.abs(out - ref)))
    assert err < 5e-2, f"kernel/reference mismatch: max abs err {err}"

    print("KERNEL_OK")
</pallas_src>

<mosaic_0001>
module attributes {stable_mosaic.version = 11 : i64} {
  func.func @_fused_backbone_kernel(%arg0: i32, %arg1: memref<1x8x32xf32, #tpu.memory_space<vmem>>, %arg2: memref<1x8x32xf32, #tpu.memory_space<vmem>>, %arg3: memref<1x1x8xf32, #tpu.memory_space<vmem>>, %arg4: memref<1x1x8xf32, #tpu.memory_space<vmem>>, %arg5: memref<1x2x8x8xf32, #tpu.memory_space<vmem>>, %arg6: memref<18x32x16xf32, #tpu.memory_space<vmem>>, %arg7: memref<18x1x16xf32, #tpu.memory_space<vmem>>, %arg8: memref<6x16x32xf32, #tpu.memory_space<vmem>>, %arg9: memref<3x1x32xf32, #tpu.memory_space<vmem>>, %arg10: memref<3x32x64xf32, #tpu.memory_space<vmem>>, %arg11: memref<3x1x64xf32, #tpu.memory_space<vmem>>, %arg12: memref<3x64x32xf32, #tpu.memory_space<vmem>>, %arg13: memref<3x1x32xf32, #tpu.memory_space<vmem>>, %arg14: memref<6x1x32xf32, #tpu.memory_space<vmem>>, %arg15: memref<6x1x32xf32, #tpu.memory_space<vmem>>, %arg16: memref<1x8x32xf32, #tpu.memory_space<vmem>>) attributes {dimension_semantics = [#tpu.dimension_semantics<parallel>], iteration_bounds = array<i64: 2>, scalar_prefetch = 0 : i64, scratch_operands = 0 : i64, tpu.core_type = #tpu.core_type<tc>, window_params = [{transform_indices = @transform_0, window_bounds = array<i64: 1, 8, 32>}, {transform_indices = @transform_1, window_bounds = array<i64: 1, 8, 32>}, {transform_indices = @transform_2, window_bounds = array<i64: 1, 1, 8>}, {transform_indices = @transform_3, window_bounds = array<i64: 1, 1, 8>}, {transform_indices = @transform_4, window_bounds = array<i64: 1, 2, 8, 8>}, {pipeline_mode = #tpu.pipeline_mode<synchronous>, transform_indices = @transform_5, window_bounds = array<i64: 18, 32, 16>}, {pipeline_mode = #tpu.pipeline_mode<synchronous>, transform_indices = @transform_6, window_bounds = array<i64: 18, 1, 16>}, {pipeline_mode = #tpu.pipeline_mode<synchronous>, transform_indices = @transform_7, window_bounds = array<i64: 6, 16, 32>}, {pipeline_mode = #tpu.pipeline_mode<synchronous>, transform_indices = @transform_8, window_bounds = array<i64: 3, 1, 32>}, {pipeline_mode = #tpu.pipeline_mode<synchronous>, transform_indices = @transform_9, window_bounds = array<i64: 3, 32, 64>}, {pipeline_mode = #tpu.pipeline_mode<synchronous>, transform_indices = @transform_10, window_bounds = array<i64: 3, 1, 64>}, {pipeline_mode = #tpu.pipeline_mode<synchronous>, transform_indices = @transform_11, window_bounds = array<i64: 3, 64, 32>}, {pipeline_mode = #tpu.pipeline_mode<synchronous>, transform_indices = @transform_12, window_bounds = array<i64: 3, 1, 32>}, {pipeline_mode = #tpu.pipeline_mode<synchronous>, transform_indices = @transform_13, window_bounds = array<i64: 6, 1, 32>}, {pipeline_mode = #tpu.pipeline_mode<synchronous>, transform_indices = @transform_14, window_bounds = array<i64: 6, 1, 32>}, {transform_indices = @transform_15, window_bounds = array<i64: 1, 8, 32>}]} {
    %c0 = arith.constant 0 : index
    %c0_0 = arith.constant 0 : index
    %c0_1 = arith.constant 0 : index
    %0 = vector.load %arg1[%c0, %c0_0, %c0_1] : memref<1x8x32xf32, #tpu.memory_space<vmem>>, vector<1x8x32xf32>
    %1 = vector.shape_cast %0 : vector<1x8x32xf32> to vector<8x32xf32>
    %c0_2 = arith.constant 0 : index
    %c0_3 = arith.constant 0 : index
    %c0_4 = arith.constant 0 : index
    %2 = vector.load %arg2[%c0_2, %c0_3, %c0_4] : memref<1x8x32xf32, #tpu.memory_space<vmem>>, vector<1x8x32xf32>
    %3 = vector.shape_cast %2 : vector<1x8x32xf32> to vector<8x32xf32>
    %c0_5 = arith.constant 0 : index
    %c0_6 = arith.constant 0 : index
    %c0_7 = arith.constant 0 : index
    %4 = vector.load %arg3[%c0_5, %c0_6, %c0_7] : memref<1x1x8xf32, #tpu.memory_space<vmem>>, vector<1x1x8xf32>
    %5 = vector.shape_cast %4 : vector<1x1x8xf32> to vector<1x8xf32>
    %c0_8 = arith.constant 0 : index
    %c0_9 = arith.constant 0 : index
    %c0_10 = arith.constant 0 : index
    %6 = vector.load %arg4[%c0_8, %c0_9, %c0_10] : memref<1x1x8xf32, #tpu.memory_space<vmem>>, vector<1x1x8xf32>
    %7 = vector.shape_cast %6 : vector<1x1x8xf32> to vector<1x8xf32>
    %cst = arith.constant 0.000000e+00 : f32
    %8 = vector.broadcast %cst : f32 to vector<8x32xf32>
    %c0_11 = arith.constant 0 : index
    %c0_12 = arith.constant 0 : index
    %c0_13 = arith.constant 0 : index
    %9 = vector.load %arg6[%c0_11, %c0_12, %c0_13] : memref<18x32x16xf32, #tpu.memory_space<vmem>>, vector<1x32x16xf32>
    %10 = vector.shape_cast %9 : vector<1x32x16xf32> to vector<32x16xf32>
    %cst_14 = arith.constant dense<0.000000e+00> : vector<8x16xf32>
    %11 = tpu.matmul %1, %10, %cst_14 {dimension_numbers = #tpu.dot_dimension_numbers<[1], [0], [0], [1], [0, 0, 1, 1], [], []>} : vector<8x32xf32>, vector<32x16xf32>, vector<8x16xf32> -> vector<8x16xf32>
    %c0_15 = arith.constant 0 : index
    %c0_16 = arith.constant 0 : index
    %c0_17 = arith.constant 0 : index
    %12 = vector.load %arg7[%c0_15, %c0_16, %c0_17] : memref<18x1x16xf32, #tpu.memory_space<vmem>>, vector<1x1x16xf32>
    %13 = vector.shape_cast %12 : vector<1x1x16xf32> to vector<1x16xf32>
    %14 = vector.broadcast %13 : vector<1x16xf32> to vector<8x16xf32>
    %15 = arith.addf %11, %14 : vector<8x16xf32>
    %c2 = arith.constant 2 : index
    %c0_18 = arith.constant 0 : index
    %c0_19 = arith.constant 0 : index
    %16 = vector.load %arg6[%c2, %c0_18, %c0_19] : memref<18x32x16xf32, #tpu.memory_space<vmem>>, vector<1x32x16xf32>
    %17 = vector.shape_cast %16 : vector<1x32x16xf32> to vector<32x16xf32>
    %cst_20 = arith.constant dense<0.000000e+00> : vector<8x16xf32>
    %18 = tpu.matmul %1, %17, %cst_20 {dimension_numbers = #tpu.dot_dimension_numbers<[1], [0], [0], [1], [0, 0, 1, 1], [], []>} : vector<8x32xf32>, vector<32x16xf32>, vector<8x16xf32> -> vector<8x16xf32>
    %c2_21 = arith.constant 2 : index
    %c0_22 = arith.constant 0 : index
    %c0_23 = arith.constant 0 : index
    %19 = vector.load %arg7[%c2_21, %c0_22, %c0_23] : memref<18x1x16xf32, #tpu.memory_space<vmem>>, vector<1x1x16xf32>
    %20 = vector.shape_cast %19 : vector<1x1x16xf32> to vector<1x16xf32>
    %21 = vector.broadcast %20 : vector<1x16xf32> to vector<8x16xf32>
    %22 = arith.addf %18, %21 : vector<8x16xf32>
    %c4 = arith.constant 4 : index
    %c0_24 = arith.constant 0 : index
    %c0_25 = arith.constant 0 : index
    %23 = vector.load %arg6[%c4, %c0_24, %c0_25] : memref<18x32x16xf32, #tpu.memory_space<vmem>>, vector<1x32x16xf32>
    %24 = vector.shape_cast %23 : vector<1x32x16xf32> to vector<32x16xf32>
    %cst_26 = arith.constant dense<0.000000e+00> : vector<8x16xf32>
    %25 = tpu.matmul %1, %24, %cst_26 {dimension_numbers = #tpu.dot_dimension_numbers<[1], [0], [0], [1], [0, 0, 1, 1], [], []>} : vector<8x32xf32>, vector<32x16xf32>, vector<8x16xf32> -> vector<8x16xf32>
    %c4_27 = arith.constant 4 : index
    %c0_28 = arith.constant 0 : index
    %c0_29 = arith.constant 0 : index
    %26 = vector.load %arg7[%c4_27, %c0_28, %c0_29] : memref<18x1x16xf32, #tpu.memory_space<vmem>>, vector<1x1x16xf32>
    %27 = vector.shape_cast %26 : vector<1x1x16xf32> to vector<1x16xf32>
    %28 = vector.broadcast %27 : vector<1x16xf32> to vector<8x16xf32>
    %29 = arith.addf %25, %28 : vector<8x16xf32>
    %cst_30 = arith.constant dense<0.000000e+00> : vector<8x8xf32>
    %30 = tpu.matmul %15, %22, %cst_30 {dimension_numbers = #tpu.dot_dimension_numbers<[1], [1], [0], [0], [0, 0, 1, 0], [], []>} : vector<8x16xf32>, vector<8x16xf32>, vector<8x8xf32> -> vector<8x8xf32>
    %cst_31 = arith.constant 2.500000e-01 : f32
    %31 = vector.broadcast %cst_31 : f32 to vector<8x8xf32>
    %32 = arith.mulf %30, %31 : vector<8x8xf32>
    %33 = vector.broadcast %5 : vector<1x8xf32> to vector<8x8xf32>
    %34 = arith.addf %32, %33 : vector<8x8xf32>
    %cst_32 = arith.constant dense<0xFF800000> : vector<8xf32>
    %35 = vector.multi_reduction <maximumf>, %34, %cst_32 [1] : vector<8x8xf32> to vector<8xf32>
    %36 = vector.shape_cast %35 : vector<8xf32> to vector<8x1xf32>
    %37 = vector.broadcast %36 : vector<8x1xf32> to vector<8x8xf32>
    %38 = arith.subf %34, %37 : vector<8x8xf32>
    %39 = math.exp %38 : vector<8x8xf32>
    %cst_33 = arith.constant dense<0.000000e+00> : vector<8xf32>
    %40 = vector.multi_reduction <add>, %39, %cst_33 [1] : vector<8x8xf32> to vector<8xf32>
    %41 = vector.shape_cast %40 : vector<8xf32> to vector<8x1xf32>
    %42 = tpu.reciprocal %41 {approx = true} : vector<8x1xf32> -> vector<8x1xf32>
    %43 = vector.broadcast %42 : vector<8x1xf32> to vector<8x8xf32>
    %44 = arith.mulf %39, %43 : vector<8x8xf32>
    %cst_34 = arith.constant dense<0.000000e+00> : vector<8x16xf32>
    %45 = tpu.matmul %44, %29, %cst_34 {dimension_numbers = #tpu.dot_dimension_numbers<[1], [0], [0], [1], [0, 0, 1, 1], [], []>} : vector<8x8xf32>, vector<8x16xf32>, vector<8x16xf32> -> vector<8x16xf32>
    %c0_35 = arith.constant 0 : index
    %c0_36 = arith.constant 0 : index
    %c0_37 = arith.constant 0 : index
    %46 = vector.load %arg8[%c0_35, %c0_36, %c0_37] : memref<6x16x32xf32, #tpu.memory_space<vmem>>, vector<1x16x32xf32>
    %47 = vector.shape_cast %46 : vector<1x16x32xf32> to vector<16x32xf32>
    %cst_38 = arith.constant dense<0.000000e+00> : vector<8x32xf32>
    %48 = tpu.matmul %45, %47, %cst_38 {dimension_numbers = #tpu.dot_dimension_numbers<[1], [0], [0], [1], [0, 0, 1, 1], [], []>} : vector<8x16xf32>, vector<16x32xf32>, vector<8x32xf32> -> vector<8x32xf32>
    %49 = arith.addf %8, %48 : vector<8x32xf32>
    %c1 = arith.constant 1 : index
    %c0_39 = arith.constant 0 : index
    %c0_40 = arith.constant 0 : index
    %50 = vector.load %arg6[%c1, %c0_39, %c0_40] : memref<18x32x16xf32, #tpu.memory_space<vmem>>, vector<1x32x16xf32>
    %51 = vector.shape_cast %50 : vector<1x32x16xf32> to vector<32x16xf32>
    %cst_41 = arith.constant dense<0.000000e+00> : vector<8x16xf32>
    %52 = tpu.matmul %1, %51, %cst_41 {dimension_numbers = #tpu.dot_dimension_numbers<[1], [0], [0], [1], [0, 0, 1, 1], [], []>} : vector<8x32xf32>, vector<32x16xf32>, vector<8x16xf32> -> vector<8x16xf32>
    %c1_42 = arith.constant 1 : index
    %c0_43 = arith.constant 0 : index
    %c0_44 = arith.constant 0 : index
    %53 = vector.load %arg7[%c1_42, %c0_43, %c0_44] : memref<18x1x16xf32, #tpu.memory_space<vmem>>, vector<1x1x16xf32>
    %54 = vector.shape_cast %53 : vector<1x1x16xf32> to vector<1x16xf32>
    %55 = vector.broadcast %54 : vector<1x16xf32> to vector<8x16xf32>
    %56 = arith.addf %52, %55 : vector<8x16xf32>
    %c3 = arith.constant 3 : index
    %c0_45 = arith.constant 0 : index
    %c0_46 = arith.constant 0 : index
    %57 = vector.load %arg6[%c3, %c0_45, %c0_46] : memref<18x32x16xf32, #tpu.memory_space<vmem>>, vector<1x32x16xf32>
    %58 = vector.shape_cast %57 : vector<1x32x16xf32> to vector<32x16xf32>
    %cst_47 = arith.constant dense<0.000000e+00> : vector<8x16xf32>
    %59 = tpu.matmul %1, %58, %cst_47 {dimension_numbers = #tpu.dot_dimension_numbers<[1], [0], [0], [1], [0, 0, 1, 1], [], []>} : vector<8x32xf32>, vector<32x16xf32>, vector<8x16xf32> -> vector<8x16xf32>
    %c3_48 = arith.constant 3 : index
    %c0_49 = arith.constant 0 : index
    %c0_50 = arith.constant 0 : index
    %60 = vector.load %arg7[%c3_48, %c0_49, %c0_50] : memref<18x1x16xf32, #tpu.memory_space<vmem>>, vector<1x1x16xf32>
    %61 = vector.shape_cast %60 : vector<1x1x16xf32> to vector<1x16xf32>
    %62 = vector.broadcast %61 : vector<1x16xf32> to vector<8x16xf32>
    %63 = arith.addf %59, %62 : vector<8x16xf32>
    %c5 = arith.constant 5 : index
    %c0_51 = arith.constant 0 : index
    %c0_52 = arith.constant 0 : index
    %64 = vector.load %arg6[%c5, %c0_51, %c0_52] : memref<18x32x16xf32, #tpu.memory_space<vmem>>, vector<1x32x16xf32>
    %65 = vector.shape_cast %64 : vector<1x32x16xf32> to vector<32x16xf32>
    %cst_53 = arith.constant dense<0.000000e+00> : vector<8x16xf32>
    %66 = tpu.matmul %1, %65, %cst_53 {dimension_numbers = #tpu.dot_dimension_numbers<[1], [0], [0], [1], [0, 0, 1, 1], [], []>} : vector<8x32xf32>, vector<32x16xf32>, vector<8x16xf32> -> vector<8x16xf32>
    %c5_54 = arith.constant 5 : index
    %c0_55 = arith.constant 0 : index
    %c0_56 = arith.constant 0 : index
    %67 = vector.load %arg7[%c5_54, %c0_55, %c0_56] : memref<18x1x16xf32, #tpu.memory_space<vmem>>, vector<1x1x16xf32>
    %68 = vector.shape_cast %67 : vector<1x1x16xf32> to vector<1x16xf32>
    %69 = vector.broadcast %68 : vector<1x16xf32> to vector<8x16xf32>
    %70 = arith.addf %66, %69 : vector<8x16xf32>
    %cst_57 = arith.constant dense<0.000000e+00> : vector<8x8xf32>
    %71 = tpu.matmul %56, %63, %cst_57 {dimension_numbers = #tpu.dot_dimension_numbers<[1], [1], [0], [0], [0, 0, 1, 0], [], []>} : vector<8x16xf32>, vector<8x16xf32>, vector<8x8xf32> -> vector<8x8xf32>
    %cst_58 = arith.constant 2.500000e-01 : f32
    %72 = vector.broadcast %cst_58 : f32 to vector<8x8xf32>
    %73 = arith.mulf %71, %72 : vector<8x8xf32>
    %74 = vector.broadcast %5 : vector<1x8xf32> to vector<8x8xf32>
    %75 = arith.addf %73, %74 : vector<8x8xf32>
    %cst_59 = arith.constant dense<0xFF800000> : vector<8xf32>
    %76 = vector.multi_reduction <maximumf>, %75, %cst_59 [1] : vector<8x8xf32> to vector<8xf32>
    %77 = vector.shape_cast %76 : vector<8xf32> to vector<8x1xf32>
    %78 = vector.broadcast %77 : vector<8x1xf32> to vector<8x8xf32>
    %79 = arith.subf %75, %78 : vector<8x8xf32>
    %80 = math.exp %79 : vector<8x8xf32>
    %cst_60 = arith.constant dense<0.000000e+00> : vector<8xf32>
    %81 = vector.multi_reduction <add>, %80, %cst_60 [1] : vector<8x8xf32> to vector<8xf32>
    %82 = vector.shape_cast %81 : vector<8xf32> to vector<8x1xf32>
    %83 = tpu.reciprocal %82 {approx = true} : vector<8x1xf32> -> vector<8x1xf32>
    %84 = vector.broadcast %83 : vector<8x1xf32> to vector<8x8xf32>
    %85 = arith.mulf %80, %84 : vector<8x8xf32>
    %cst_61 = arith.constant dense<0.000000e+00> : vector<8x16xf32>
    %86 = tpu.matmul %85, %70, %cst_61 {dimension_numbers = #tpu.dot_dimension_numbers<[1], [0], [0], [1], [0, 0, 1, 1], [], []>} : vector<8x8xf32>, vector<8x16xf32>, vector<8x16xf32> -> vector<8x16xf32>
    %c1_62 = arith.constant 1 : index
    %c0_63 = arith.constant 0 : index
    %c0_64 = arith.constant 0 : index
    %87 = vector.load %arg8[%c1_62, %c0_63, %c0_64] : memref<6x16x32xf32, #tpu.memory_space<vmem>>, vector<1x16x32xf32>
    %88 = vector.shape_cast %87 : vector<1x16x32xf32> to vector<16x32xf32>
    %cst_65 = arith.constant dense<0.000000e+00> : vector<8x32xf32>
    %89 = tpu.matmul %86, %88, %cst_65 {dimension_numbers = #tpu.dot_dimension_numbers<[1], [0], [0], [1], [0, 0, 1, 1], [], []>} : vector<8x16xf32>, vector<16x32xf32>, vector<8x32xf32> -> vector<8x32xf32>
    %90 = arith.addf %49, %89 : vector<8x32xf32>
    %c0_66 = arith.constant 0 : index
    %c0_67 = arith.constant 0 : index
    %c0_68 = arith.constant 0 : index
    %91 = vector.load %arg9[%c0_66, %c0_67, %c0_68] : memref<3x1x32xf32, #tpu.memory_space<vmem>>, vector<1x1x32xf32>
    %92 = vector.shape_cast %91 : vector<1x1x32xf32> to vector<1x32xf32>
    %93 = vector.broadcast %92 : vector<1x32xf32> to vector<8x32xf32>
    %94 = arith.addf %90, %93 : vector<8x32xf32>
    %95 = arith.addf %1, %94 : vector<8x32xf32>
    %c0_69 = arith.constant 0 : index
    %c0_70 = arith.constant 0 : index
    %c0_71 = arith.constant 0 : index
    %96 = vector.load %arg14[%c0_69, %c0_70, %c0_71] : memref<6x1x32xf32, #tpu.memory_space<vmem>>, vector<1x1x32xf32>
    %97 = vector.shape_cast %96 : vector<1x1x32xf32> to vector<1x32xf32>
    %c0_72 = arith.constant 0 : index
    %c0_73 = arith.constant 0 : index
    %c0_74 = arith.constant 0 : index
    %98 = vector.load %arg15[%c0_72, %c0_73, %c0_74] : memref<6x1x32xf32, #tpu.memory_space<vmem>>, vector<1x1x32xf32>
    %99 = vector.shape_cast %98 : vector<1x1x32xf32> to vector<1x32xf32>
    %cst_75 = arith.constant dense<0.000000e+00> : vector<8xf32>
    %100 = vector.multi_reduction <add>, %95, %cst_75 [1] : vector<8x32xf32> to vector<8xf32>
    %101 = vector.shape_cast %100 : vector<8xf32> to vector<8x1xf32>
    %cst_76 = arith.constant 3.200000e+01 : f32
    %102 = vector.broadcast %cst_76 : f32 to vector<8x1xf32>
    %103 = arith.divf %101, %102 : vector<8x1xf32>
    %104 = vector.broadcast %103 : vector<8x1xf32> to vector<8x32xf32>
    %105 = arith.subf %95, %104 : vector<8x32xf32>
    %106 = arith.mulf %105, %105 : vector<8x32xf32>
    %cst_77 = arith.constant dense<0.000000e+00> : vector<8xf32>
    %107 = vector.multi_reduction <add>, %106, %cst_77 [1] : vector<8x32xf32> to vector<8xf32>
    %108 = vector.shape_cast %107 : vector<8xf32> to vector<8x1xf32>
    %cst_78 = arith.constant 3.200000e+01 : f32
    %109 = vector.broadcast %cst_78 : f32 to vector<8x1xf32>
    %110 = arith.divf %108, %109 : vector<8x1xf32>
    %111 = vector.broadcast %103 : vector<8x1xf32> to vector<8x32xf32>
    %112 = arith.subf %95, %111 : vector<8x32xf32>
    %cst_79 = arith.constant 9.99999974E-6 : f32
    %113 = vector.broadcast %cst_79 : f32 to vector<8x1xf32>
    %114 = arith.addf %110, %113 : vector<8x1xf32>
    %115 = math.rsqrt %114 : vector<8x1xf32>
    %116 = vector.broadcast %115 : vector<8x1xf32> to vector<8x32xf32>
    %117 = arith.mulf %112, %116 : vector<8x32xf32>
    %118 = vector.broadcast %97 : vector<1x32xf32> to vector<8x32xf32>
    %119 = arith.mulf %117, %118 : vector<8x32xf32>
    %120 = vector.broadcast %99 : vector<1x32xf32> to vector<8x32xf32>
    %121 = arith.addf %119, %120 : vector<8x32xf32>
    %c0_80 = arith.constant 0 : index
    %c0_81 = arith.constant 0 : index
    %c0_82 = arith.constant 0 : index
    %122 = vector.load %arg10[%c0_80, %c0_81, %c0_82] : memref<3x32x64xf32, #tpu.memory_space<vmem>>, vector<1x32x64xf32>
    %123 = vector.shape_cast %122 : vector<1x32x64xf32> to vector<32x64xf32>
    %cst_83 = arith.constant dense<0.000000e+00> : vector<8x64xf32>
    %124 = tpu.matmul %121, %123, %cst_83 {dimension_numbers = #tpu.dot_dimension_numbers<[1], [0], [0], [1], [0, 0, 1, 1], [], []>} : vector<8x32xf32>, vector<32x64xf32>, vector<8x64xf32> -> vector<8x64xf32>
    %c0_84 = arith.constant 0 : index
    %c0_85 = arith.constant 0 : index
    %c0_86 = arith.constant 0 : index
    %125 = vector.load %arg11[%c0_84, %c0_85, %c0_86] : memref<3x1x64xf32, #tpu.memory_space<vmem>>, vector<1x1x64xf32>
    %126 = vector.shape_cast %125 : vector<1x1x64xf32> to vector<1x64xf32>
    %127 = vector.broadcast %126 : vector<1x64xf32> to vector<8x64xf32>
    %128 = arith.addf %124, %127 : vector<8x64xf32>
    %cst_87 = arith.constant 0.000000e+00 : f32
    %129 = vector.broadcast %cst_87 : f32 to vector<8x64xf32>
    %130 = arith.maximumf %128, %129 : vector<8x64xf32>
    %c0_88 = arith.constant 0 : index
    %c0_89 = arith.constant 0 : index
    %c0_90 = arith.constant 0 : index
    %131 = vector.load %arg12[%c0_88, %c0_89, %c0_90] : memref<3x64x32xf32, #tpu.memory_space<vmem>>, vector<1x64x32xf32>
    %132 = vector.shape_cast %131 : vector<1x64x32xf32> to vector<64x32xf32>
    %cst_91 = arith.constant dense<0.000000e+00> : vector<8x32xf32>
    %133 = tpu.matmul %130, %132, %cst_91 {dimension_numbers = #tpu.dot_dimension_numbers<[1], [0], [0], [1], [0, 0, 1, 1], [], []>} : vector<8x64xf32>, vector<64x32xf32>, vector<8x32xf32> -> vector<8x32xf32>
    %c0_92 = arith.constant 0 : index
    %c0_93 = arith.constant 0 : index
    %c0_94 = arith.constant 0 : index
    %134 = vector.load %arg13[%c0_92, %c0_93, %c0_94] : memref<3x1x32xf32, #tpu.memory_space<vmem>>, vector<1x1x32xf32>
    %135 = vector.shape_cast %134 : vector<1x1x32xf32> to vector<1x32xf32>
    %136 = vector.broadcast %135 : vector<1x32xf32> to vector<8x32xf32>
    %137 = arith.addf %133, %136 : vector<8x32xf32>
    %138 = arith.addf %121, %137 : vector<8x32xf32>
    %c1_95 = arith.constant 1 : index
    %c0_96 = arith.constant 0 : index
    %c0_97 = arith.constant 0 : index
    %139 = vector.load %arg14[%c1_95, %c0_96, %c0_97] : memref<6x1x32xf32, #tpu.memory_space<vmem>>, vector<1x1x32xf32>
    %140 = vector.shape_cast %139 : vector<1x1x32xf32> to vector<1x32xf32>
    %c1_98 = arith.constant 1 : index
    %c0_99 = arith.constant 0 : index
    %c0_100 = arith.constant 0 : index
    %141 = vector.load %arg15[%c1_98, %c0_99, %c0_100] : memref<6x1x32xf32, #tpu.memory_space<vmem>>, vector<1x1x32xf32>
    %142 = vector.shape_cast %141 : vector<1x1x32xf32> to vector<1x32xf32>
    %cst_101 = arith.constant dense<0.000000e+00> : vector<8xf32>
    %143 = vector.multi_reduction <add>, %138, %cst_101 [1] : vector<8x32xf32> to vector<8xf32>
    %144 = vector.shape_cast %143 : vector<8xf32> to vector<8x1xf32>
    %cst_102 = arith.constant 3.200000e+01 : f32
    %145 = vector.broadcast %cst_102 : f32 to vector<8x1xf32>
    %146 = arith.divf %144, %145 : vector<8x1xf32>
    %147 = vector.broadcast %146 : vector<8x1xf32> to vector<8x32xf32>
    %148 = arith.subf %138, %147 : vector<8x32xf32>
    %149 = arith.mulf %148, %148 : vector<8x32xf32>
    %cst_103 = arith.constant dense<0.000000e+00> : vector<8xf32>
    %150 = vector.multi_reduction <add>, %149, %cst_103 [1] : vector<8x32xf32> to vector<8xf32>
    %151 = vector.shape_cast %150 : vector<8xf32> to vector<8x1xf32>
    %cst_104 = arith.constant 3.200000e+01 : f32
    %152 = vector.broadcast %cst_104 : f32 to vector<8x1xf32>
    %153 = arith.divf %151, %152 : vector<8x1xf32>
    %154 = vector.broadcast %146 : vector<8x1xf32> to vector<8x32xf32>
    %155 = arith.subf %138, %154 : vector<8x32xf32>
    %cst_105 = arith.constant 9.99999974E-6 : f32
    %156 = vector.broadcast %cst_105 : f32 to vector<8x1xf32>
    %157 = arith.addf %153, %156 : vector<8x1xf32>
    %158 = math.rsqrt %157 : vector<8x1xf32>
    %159 = vector.broadcast %158 : vector<8x1xf32> to vector<8x32xf32>
    %160 = arith.mulf %155, %159 : vector<8x32xf32>
    %161 = vector.broadcast %140 : vector<1x32xf32> to vector<8x32xf32>
    %162 = arith.mulf %160, %161 : vector<8x32xf32>
    %163 = vector.broadcast %142 : vector<1x32xf32> to vector<8x32xf32>
    %164 = arith.addf %162, %163 : vector<8x32xf32>
    %cst_106 = arith.constant 0.000000e+00 : f32
    %165 = vector.broadcast %cst_106 : f32 to vector<8x32xf32>
    %c6 = arith.constant 6 : index
    %c0_107 = arith.constant 0 : index
    %c0_108 = arith.constant 0 : index
    %166 = vector.load %arg6[%c6, %c0_107, %c0_108] : memref<18x32x16xf32, #tpu.memory_space<vmem>>, vector<1x32x16xf32>
    %167 = vector.shape_cast %166 : vector<1x32x16xf32> to vector<32x16xf32>
    %cst_109 = arith.constant dense<0.000000e+00> : vector<8x16xf32>
    %168 = tpu.matmul %164, %167, %cst_109 {dimension_numbers = #tpu.dot_dimension_numbers<[1], [0], [0], [1], [0, 0, 1, 1], [], []>} : vector<8x32xf32>, vector<32x16xf32>, vector<8x16xf32> -> vector<8x16xf32>
    %c6_110 = arith.constant 6 : index
    %c0_111 = arith.constant 0 : index
    %c0_112 = arith.constant 0 : index
    %169 = vector.load %arg7[%c6_110, %c0_111, %c0_112] : memref<18x1x16xf32, #tpu.memory_space<vmem>>, vector<1x1x16xf32>
    %170 = vector.shape_cast %169 : vector<1x1x16xf32> to vector<1x16xf32>
    %171 = vector.broadcast %170 : vector<1x16xf32> to vector<8x16xf32>
    %172 = arith.addf %168, %171 : vector<8x16xf32>
    %c8 = arith.constant 8 : index
    %c0_113 = arith.constant 0 : index
    %c0_114 = arith.constant 0 : index
    %173 = vector.load %arg6[%c8, %c0_113, %c0_114] : memref<18x32x16xf32, #tpu.memory_space<vmem>>, vector<1x32x16xf32>
    %174 = vector.shape_cast %173 : vector<1x32x16xf32> to vector<32x16xf32>
    %cst_115 = arith.constant dense<0.000000e+00> : vector<8x16xf32>
    %175 = tpu.matmul %3, %174, %cst_115 {dimension_numbers = #tpu.dot_dimension_numbers<[1], [0], [0], [1], [0, 0, 1, 1], [], []>} : vector<8x32xf32>, vector<32x16xf32>, vector<8x16xf32> -> vector<8x16xf32>
    %c8_116 = arith.constant 8 : index
    %c0_117 = arith.constant 0 : index
    %c0_118 = arith.constant 0 : index
    %176 = vector.load %arg7[%c8_116, %c0_117, %c0_118] : memref<18x1x16xf32, #tpu.memory_space<vmem>>, vector<1x1x16xf32>
    %177 = vector.shape_cast %176 : vector<1x1x16xf32> to vector<1x16xf32>
    %178 = vector.broadcast %177 : vector<1x16xf32> to vector<8x16xf32>
    %179 = arith.addf %175, %178 : vector<8x16xf32>
    %c10 = arith.constant 10 : index
    %c0_119 = arith.constant 0 : index
    %c0_120 = arith.constant 0 : index
    %180 = vector.load %arg6[%c10, %c0_119, %c0_120] : memref<18x32x16xf32, #tpu.memory_space<vmem>>, vector<1x32x16xf32>
    %181 = vector.shape_cast %180 : vector<1x32x16xf32> to vector<32x16xf32>
    %cst_121 = arith.constant dense<0.000000e+00> : vector<8x16xf32>
    %182 = tpu.matmul %3, %181, %cst_121 {dimension_numbers = #tpu.dot_dimension_numbers<[1], [0], [0], [1], [0, 0, 1, 1], [], []>} : vector<8x32xf32>, vector<32x16xf32>, vector<8x16xf32> -> vector<8x16xf32>
    %c10_122 = arith.constant 10 : index
    %c0_123 = arith.constant 0 : index
    %c0_124 = arith.constant 0 : index
    %183 = vector.load %arg7[%c10_122, %c0_123, %c0_124] : memref<18x1x16xf32, #tpu.memory_space<vmem>>, vector<1x1x16xf32>
    %184 = vector.shape_cast %183 : vector<1x1x16xf32> to vector<1x16xf32>
    %185 = vector.broadcast %184 : vector<1x16xf32> to vector<8x16xf32>
    %186 = arith.addf %182, %185 : vector<8x16xf32>
    %cst_125 = arith.constant dense<0.000000e+00> : vector<8x8xf32>
    %187 = tpu.matmul %172, %179, %cst_125 {dimension_numbers = #tpu.dot_dimension_numbers<[1], [1], [0], [0], [0, 0, 1, 0], [], []>} : vector<8x16xf32>, vector<8x16xf32>, vector<8x8xf32> -> vector<8x8xf32>
    %cst_126 = arith.constant 2.500000e-01 : f32
    %188 = vector.broadcast %cst_126 : f32 to vector<8x8xf32>
    %189 = arith.mulf %187, %188 : vector<8x8xf32>
    %190 = vector.broadcast %7 : vector<1x8xf32> to vector<8x8xf32>
    %191 = arith.addf %189, %190 : vector<8x8xf32>
    %c0_127 = arith.constant 0 : index
    %c0_128 = arith.constant 0 : index
    %c0_129 = arith.constant 0 : index
    %c0_130 = arith.constant 0 : index
    %192 = vector.load %arg5[%c0_127, %c0_128, %c0_129, %c0_130] : memref<1x2x8x8xf32, #tpu.memory_space<vmem>>, vector<1x1x8x8xf32>
    %193 = vector.shape_cast %192 : vector<1x1x8x8xf32> to vector<8x8xf32>
    %194 = arith.addf %191, %193 : vector<8x8xf32>
    %cst_131 = arith.constant dense<0xFF800000> : vector<8xf32>
    %195 = vector.multi_reduction <maximumf>, %194, %cst_131 [1] : vector<8x8xf32> to vector<8xf32>
    %196 = vector.shape_cast %195 : vector<8xf32> to vector<8x1xf32>
    %197 = vector.broadcast %196 : vector<8x1xf32> to vector<8x8xf32>
    %198 = arith.subf %194, %197 : vector<8x8xf32>
    %199 = math.exp %198 : vector<8x8xf32>
    %cst_132 = arith.constant dense<0.000000e+00> : vector<8xf32>
    %200 = vector.multi_reduction <add>, %199, %cst_132 [1] : vector<8x8xf32> to vector<8xf32>
    %201 = vector.shape_cast %200 : vector<8xf32> to vector<8x1xf32>
    %202 = tpu.reciprocal %201 {approx = true} : vector<8x1xf32> -> vector<8x1xf32>
    %203 = vector.broadcast %202 : vector<8x1xf32> to vector<8x8xf32>
    %204 = arith.mulf %199, %203 : vector<8x8xf32>
    %cst_133 = arith.constant dense<0.000000e+00> : vector<8x16xf32>
    %205 = tpu.matmul %204, %186, %cst_133 {dimension_numbers = #tpu.dot_dimension_numbers<[1], [0], [0], [1], [0, 0, 1, 1], [], []>} : vector<8x8xf32>, vector<8x16xf32>, vector<8x16xf32> -> vector<8x16xf32>
    %c2_134 = arith.constant 2 : index
    %c0_135 = arith.constant 0 : index
    %c0_136 = arith.constant 0 : index
    %206 = vector.load %arg8[%c2_134, %c0_135, %c0_136] : memref<6x16x32xf32, #tpu.memory_space<vmem>>, vector<1x16x32xf32>
    %207 = vector.shape_cast %206 : vector<1x16x32xf32> to vector<16x32xf32>
    %cst_137 = arith.constant dense<0.000000e+00> : vector<8x32xf32>
    %208 = tpu.matmul %205, %207, %cst_137 {dimension_numbers = #tpu.dot_dimension_numbers<[1], [0], [0], [1], [0, 0, 1, 1], [], []>} : vector<8x16xf32>, vector<16x32xf32>, vector<8x32xf32> -> vector<8x32xf32>
    %209 = arith.addf %165, %208 : vector<8x32xf32>
    %c7 = arith.constant 7 : index
    %c0_138 = arith.constant 0 : index
    %c0_139 = arith.constant 0 : index
    %210 = vector.load %arg6[%c7, %c0_138, %c0_139] : memref<18x32x16xf32, #tpu.memory_space<vmem>>, vector<1x32x16xf32>
    %211 = vector.shape_cast %210 : vector<1x32x16xf32> to vector<32x16xf32>
    %cst_140 = arith.constant dense<0.000000e+00> : vector<8x16xf32>
    %212 = tpu.matmul %164, %211, %cst_140 {dimension_numbers = #tpu.dot_dimension_numbers<[1], [0], [0], [1], [0, 0, 1, 1], [], []>} : vector<8x32xf32>, vector<32x16xf32>, vector<8x16xf32> -> vector<8x16xf32>
    %c7_141 = arith.constant 7 : index
    %c0_142 = arith.constant 0 : index
    %c0_143 = arith.constant 0 : index
    %213 = vector.load %arg7[%c7_141, %c0_142, %c0_143] : memref<18x1x16xf32, #tpu.memory_space<vmem>>, vector<1x1x16xf32>
    %214 = vector.shape_cast %213 : vector<1x1x16xf32> to vector<1x16xf32>
    %215 = vector.broadcast %214 : vector<1x16xf32> to vector<8x16xf32>
    %216 = arith.addf %212, %215 : vector<8x16xf32>
    %c9 = arith.constant 9 : index
    %c0_144 = arith.constant 0 : index
    %c0_145 = arith.constant 0 : index
    %217 = vector.load %arg6[%c9, %c0_144, %c0_145] : memref<18x32x16xf32, #tpu.memory_space<vmem>>, vector<1x32x16xf32>
    %218 = vector.shape_cast %217 : vector<1x32x16xf32> to vector<32x16xf32>
    %cst_146 = arith.constant dense<0.000000e+00> : vector<8x16xf32>
    %219 = tpu.matmul %3, %218, %cst_146 {dimension_numbers = #tpu.dot_dimension_numbers<[1], [0], [0], [1], [0, 0, 1, 1], [], []>} : vector<8x32xf32>, vector<32x16xf32>, vector<8x16xf32> -> vector<8x16xf32>
    %c9_147 = arith.constant 9 : index
    %c0_148 = arith.constant 0 : index
    %c0_149 = arith.constant 0 : index
    %220 = vector.load %arg7[%c9_147, %c0_148, %c0_149] : memref<18x1x16xf32, #tpu.memory_space<vmem>>, vector<1x1x16xf32>
    %221 = vector.shape_cast %220 : vector<1x1x16xf32> to vector<1x16xf32>
    %222 = vector.broadcast %221 : vector<1x16xf32> to vector<8x16xf32>
    %223 = arith.addf %219, %222 : vector<8x16xf32>
    %c11 = arith.constant 11 : index
    %c0_150 = arith.constant 0 : index
    %c0_151 = arith.constant 0 : index
    %224 = vector.load %arg6[%c11, %c0_150, %c0_151] : memref<18x32x16xf32, #tpu.memory_space<vmem>>, vector<1x32x16xf32>
    %225 = vector.shape_cast %224 : vector<1x32x16xf32> to vector<32x16xf32>
    %cst_152 = arith.constant dense<0.000000e+00> : vector<8x16xf32>
    %226 = tpu.matmul %3, %225, %cst_152 {dimension_numbers = #tpu.dot_dimension_numbers<[1], [0], [0], [1], [0, 0, 1, 1], [], []>} : vector<8x32xf32>, vector<32x16xf32>, vector<8x16xf32> -> vector<8x16xf32>
    %c11_153 = arith.constant 11 : index
    %c0_154 = arith.constant 0 : index
    %c0_155 = arith.constant 0 : index
    %227 = vector.load %arg7[%c11_153, %c0_154, %c0_155] : memref<18x1x16xf32, #tpu.memory_space<vmem>>, vector<1x1x16xf32>
    %228 = vector.shape_cast %227 : vector<1x1x16xf32> to vector<1x16xf32>
    %229 = vector.broadcast %228 : vector<1x16xf32> to vector<8x16xf32>
    %230 = arith.addf %226, %229 : vector<8x16xf32>
    %cst_156 = arith.constant dense<0.000000e+00> : vector<8x8xf32>
    %231 = tpu.matmul %216, %223, %cst_156 {dimension_numbers = #tpu.dot_dimension_numbers<[1], [1], [0], [0], [0, 0, 1, 0], [], []>} : vector<8x16xf32>, vector<8x16xf32>, vector<8x8xf32> -> vector<8x8xf32>
    %cst_157 = arith.constant 2.500000e-01 : f32
    %232 = vector.broadcast %cst_157 : f32 to vector<8x8xf32>
    %233 = arith.mulf %231, %232 : vector<8x8xf32>
    %234 = vector.broadcast %7 : vector<1x8xf32> to vector<8x8xf32>
    %235 = arith.addf %233, %234 : vector<8x8xf32>
    %c0_158 = arith.constant 0 : index
    %c1_159 = arith.constant 1 : index
    %c0_160 = arith.constant 0 : index
    %c0_161 = arith.constant 0 : index
    %236 = vector.load %arg5[%c0_158, %c1_159, %c0_160, %c0_161] : memref<1x2x8x8xf32, #tpu.memory_space<vmem>>, vector<1x1x8x8xf32>
    %237 = vector.shape_cast %236 : vector<1x1x8x8xf32> to vector<8x8xf32>
    %238 = arith.addf %235, %237 : vector<8x8xf32>
    %cst_162 = arith.constant dense<0xFF800000> : vector<8xf32>
    %239 = vector.multi_reduction <maximumf>, %238, %cst_162 [1] : vector<8x8xf32> to vector<8xf32>
    %240 = vector.shape_cast %239 : vector<8xf32> to vector<8x1xf32>
    %241 = vector.broadcast %240 : vector<8x1xf32> to vector<8x8xf32>
    %242 = arith.subf %238, %241 : vector<8x8xf32>
    %243 = math.exp %242 : vector<8x8xf32>
    %cst_163 = arith.constant dense<0.000000e+00> : vector<8xf32>
    %244 = vector.multi_reduction <add>, %243, %cst_163 [1] : vector<8x8xf32> to vector<8xf32>
    %245 = vector.shape_cast %244 : vector<8xf32> to vector<8x1xf32>
    %246 = tpu.reciprocal %245 {approx = true} : vector<8x1xf32> -> vector<8x1xf32>
    %247 = vector.broadcast %246 : vector<8x1xf32> to vector<8x8xf32>
    %248 = arith.mulf %243, %247 : vector<8x8xf32>
    %cst_164 = arith.constant dense<0.000000e+00> : vector<8x16xf32>
    %249 = tpu.matmul %248, %230, %cst_164 {dimension_numbers = #tpu.dot_dimension_numbers<[1], [0], [0], [1], [0, 0, 1, 1], [], []>} : vector<8x8xf32>, vector<8x16xf32>, vector<8x16xf32> -> vector<8x16xf32>
    %c3_165 = arith.constant 3 : index
    %c0_166 = arith.constant 0 : index
    %c0_167 = arith.constant 0 : index
    %250 = vector.load %arg8[%c3_165, %c0_166, %c0_167] : memref<6x16x32xf32, #tpu.memory_space<vmem>>, vector<1x16x32xf32>
    %251 = vector.shape_cast %250 : vector<1x16x32xf32> to vector<16x32xf32>
    %cst_168 = arith.constant dense<0.000000e+00> : vector<8x32xf32>
    %252 = tpu.matmul %249, %251, %cst_168 {dimension_numbers = #tpu.dot_dimension_numbers<[1], [0], [0], [1], [0, 0, 1, 1], [], []>} : vector<8x16xf32>, vector<16x32xf32>, vector<8x32xf32> -> vector<8x32xf32>
    %253 = arith.addf %209, %252 : vector<8x32xf32>
    %c1_169 = arith.constant 1 : index
    %c0_170 = arith.constant 0 : index
    %c0_171 = arith.constant 0 : index
    %254 = vector.load %arg9[%c1_169, %c0_170, %c0_171] : memref<3x1x32xf32, #tpu.memory_space<vmem>>, vector<1x1x32xf32>
    %255 = vector.shape_cast %254 : vector<1x1x32xf32> to vector<1x32xf32>
    %256 = vector.broadcast %255 : vector<1x32xf32> to vector<8x32xf32>
    %257 = arith.addf %253, %256 : vector<8x32xf32>
    %258 = arith.addf %164, %257 : vector<8x32xf32>
    %c2_172 = arith.constant 2 : index
    %c0_173 = arith.constant 0 : index
    %c0_174 = arith.constant 0 : index
    %259 = vector.load %arg14[%c2_172, %c0_173, %c0_174] : memref<6x1x32xf32, #tpu.memory_space<vmem>>, vector<1x1x32xf32>
    %260 = vector.shape_cast %259 : vector<1x1x32xf32> to vector<1x32xf32>
    %c2_175 = arith.constant 2 : index
    %c0_176 = arith.constant 0 : index
    %c0_177 = arith.constant 0 : index
    %261 = vector.load %arg15[%c2_175, %c0_176, %c0_177] : memref<6x1x32xf32, #tpu.memory_space<vmem>>, vector<1x1x32xf32>
    %262 = vector.shape_cast %261 : vector<1x1x32xf32> to vector<1x32xf32>
    %cst_178 = arith.constant dense<0.000000e+00> : vector<8xf32>
    %263 = vector.multi_reduction <add>, %258, %cst_178 [1] : vector<8x32xf32> to vector<8xf32>
    %264 = vector.shape_cast %263 : vector<8xf32> to vector<8x1xf32>
    %cst_179 = arith.constant 3.200000e+01 : f32
    %265 = vector.broadcast %cst_179 : f32 to vector<8x1xf32>
    %266 = arith.divf %264, %265 : vector<8x1xf32>
    %267 = vector.broadcast %266 : vector<8x1xf32> to vector<8x32xf32>
    %268 = arith.subf %258, %267 : vector<8x32xf32>
    %269 = arith.mulf %268, %268 : vector<8x32xf32>
    %cst_180 = arith.constant dense<0.000000e+00> : vector<8xf32>
    %270 = vector.multi_reduction <add>, %269, %cst_180 [1] : vector<8x32xf32> to vector<8xf32>
    %271 = vector.shape_cast %270 : vector<8xf32> to vector<8x1xf32>
    %cst_181 = arith.constant 3.200000e+01 : f32
    %272 = vector.broadcast %cst_181 : f32 to vector<8x1xf32>
    %273 = arith.divf %271, %272 : vector<8x1xf32>
    %274 = vector.broadcast %266 : vector<8x1xf32> to vector<8x32xf32>
    %275 = arith.subf %258, %274 : vector<8x32xf32>
    %cst_182 = arith.constant 9.99999974E-6 : f32
    %276 = vector.broadcast %cst_182 : f32 to vector<8x1xf32>
    %277 = arith.addf %273, %276 : vector<8x1xf32>
    %278 = math.rsqrt %277 : vector<8x1xf32>
    %279 = vector.broadcast %278 : vector<8x1xf32> to vector<8x32xf32>
    %280 = arith.mulf %275, %279 : vector<8x32xf32>
    %281 = vector.broadcast %260 : vector<1x32xf32> to vector<8x32xf32>
    %282 = arith.mulf %280, %281 : vector<8x32xf32>
    %283 = vector.broadcast %262 : vector<1x32xf32> to vector<8x32xf32>
    %284 = arith.addf %282, %283 : vector<8x32xf32>
    %c1_183 = arith.constant 1 : index
    %c0_184 = arith.constant 0 : index
    %c0_185 = arith.constant 0 : index
    %285 = vector.load %arg10[%c1_183, %c0_184, %c0_185] : memref<3x32x64xf32, #tpu.memory_space<vmem>>, vector<1x32x64xf32>
    %286 = vector.shape_cast %285 : vector<1x32x64xf32> to vector<32x64xf32>
    %cst_186 = arith.constant dense<0.000000e+00> : vector<8x64xf32>
    %287 = tpu.matmul %284, %286, %cst_186 {dimension_numbers = #tpu.dot_dimension_numbers<[1], [0], [0], [1], [0, 0, 1, 1], [], []>} : vector<8x32xf32>, vector<32x64xf32>, vector<8x64xf32> -> vector<8x64xf32>
    %c1_187 = arith.constant 1 : index
    %c0_188 = arith.constant 0 : index
    %c0_189 = arith.constant 0 : index
    %288 = vector.load %arg11[%c1_187, %c0_188, %c0_189] : memref<3x1x64xf32, #tpu.memory_space<vmem>>, vector<1x1x64xf32>
    %289 = vector.shape_cast %288 : vector<1x1x64xf32> to vector<1x64xf32>
    %290 = vector.broadcast %289 : vector<1x64xf32> to vector<8x64xf32>
    %291 = arith.addf %287, %290 : vector<8x64xf32>
    %cst_190 = arith.constant 0.000000e+00 : f32
    %292 = vector.broadcast %cst_190 : f32 to vector<8x64xf32>
    %293 = arith.maximumf %291, %292 : vector<8x64xf32>
    %c1_191 = arith.constant 1 : index
    %c0_192 = arith.constant 0 : index
    %c0_193 = arith.constant 0 : index
    %294 = vector.load %arg12[%c1_191, %c0_192, %c0_193] : memref<3x64x32xf32, #tpu.memory_space<vmem>>, vector<1x64x32xf32>
    %295 = vector.shape_cast %294 : vector<1x64x32xf32> to vector<64x32xf32>
    %cst_194 = arith.constant dense<0.000000e+00> : vector<8x32xf32>
    %296 = tpu.matmul %293, %295, %cst_194 {dimension_numbers = #tpu.dot_dimension_numbers<[1], [0], [0], [1], [0, 0, 1, 1], [], []>} : vector<8x64xf32>, vector<64x32xf32>, vector<8x32xf32> -> vector<8x32xf32>
    %c1_195 = arith.constant 1 : index
    %c0_196 = arith.constant 0 : index
    %c0_197 = arith.constant 0 : index
    %297 = vector.load %arg13[%c1_195, %c0_196, %c0_197] : memref<3x1x32xf32, #tpu.memory_space<vmem>>, vector<1x1x32xf32>
    %298 = vector.shape_cast %297 : vector<1x1x32xf32> to vector<1x32xf32>
    %299 = vector.broadcast %298 : vector<1x32xf32> to vector<8x32xf32>
    %300 = arith.addf %296, %299 : vector<8x32xf32>
    %301 = arith.addf %284, %300 : vector<8x32xf32>
    %c3_198 = arith.constant 3 : index
    %c0_199 = arith.constant 0 : index
    %c0_200 = arith.constant 0 : index
    %302 = vector.load %arg14[%c3_198, %c0_199, %c0_200] : memref<6x1x32xf32, #tpu.memory_space<vmem>>, vector<1x1x32xf32>
    %303 = vector.shape_cast %302 : vector<1x1x32xf32> to vector<1x32xf32>
    %c3_201 = arith.constant 3 : index
    %c0_202 = arith.constant 0 : index
    %c0_203 = arith.constant 0 : index
    %304 = vector.load %arg15[%c3_201, %c0_202, %c0_203] : memref<6x1x32xf32, #tpu.memory_space<vmem>>, vector<1x1x32xf32>
    %305 = vector.shape_cast %304 : vector<1x1x32xf32> to vector<1x32xf32>
    %cst_204 = arith.constant dense<0.000000e+00> : vector<8xf32>
    %306 = vector.multi_reduction <add>, %301, %cst_204 [1] : vector<8x32xf32> to vector<8xf32>
    %307 = vector.shape_cast %306 : vector<8xf32> to vector<8x1xf32>
    %cst_205 = arith.constant 3.200000e+01 : f32
    %308 = vector.broadcast %cst_205 : f32 to vector<8x1xf32>
    %309 = arith.divf %307, %308 : vector<8x1xf32>
    %310 = vector.broadcast %309 : vector<8x1xf32> to vector<8x32xf32>
    %311 = arith.subf %301, %310 : vector<8x32xf32>
    %312 = arith.mulf %311, %311 : vector<8x32xf32>
    %cst_206 = arith.constant dense<0.000000e+00> : vector<8xf32>
    %313 = vector.multi_reduction <add>, %312, %cst_206 [1] : vector<8x32xf32> to vector<8xf32>
    %314 = vector.shape_cast %313 : vector<8xf32> to vector<8x1xf32>
    %cst_207 = arith.constant 3.200000e+01 : f32
    %315 = vector.broadcast %cst_207 : f32 to vector<8x1xf32>
    %316 = arith.divf %314, %315 : vector<8x1xf32>
    %317 = vector.broadcast %309 : vector<8x1xf32> to vector<8x32xf32>
    %318 = arith.subf %301, %317 : vector<8x32xf32>
    %cst_208 = arith.constant 9.99999974E-6 : f32
    %319 = vector.broadcast %cst_208 : f32 to vector<8x1xf32>
    %320 = arith.addf %316, %319 : vector<8x1xf32>
    %321 = math.rsqrt %320 : vector<8x1xf32>
    %322 = vector.broadcast %321 : vector<8x1xf32> to vector<8x32xf32>
    %323 = arith.mulf %318, %322 : vector<8x32xf32>
    %324 = vector.broadcast %303 : vector<1x32xf32> to vector<8x32xf32>
    %325 = arith.mulf %323, %324 : vector<8x32xf32>
    %326 = vector.broadcast %305 : vector<1x32xf32> to vector<8x32xf32>
    %327 = arith.addf %325, %326 : vector<8x32xf32>
    %cst_209 = arith.constant 0.000000e+00 : f32
    %328 = vector.broadcast %cst_209 : f32 to vector<8x32xf32>
    %c12 = arith.constant 12 : index
    %c0_210 = arith.constant 0 : index
    %c0_211 = arith.constant 0 : index
    %329 = vector.load %arg6[%c12, %c0_210, %c0_211] : memref<18x32x16xf32, #tpu.memory_space<vmem>>, vector<1x32x16xf32>
    %330 = vector.shape_cast %329 : vector<1x32x16xf32> to vector<32x16xf32>
    %cst_212 = arith.constant dense<0.000000e+00> : vector<8x16xf32>
    %331 = tpu.matmul %327, %330, %cst_212 {dimension_numbers = #tpu.dot_dimension_numbers<[1], [0], [0], [1], [0, 0, 1, 1], [], []>} : vector<8x32xf32>, vector<32x16xf32>, vector<8x16xf32> -> vector<8x16xf32>
    %c12_213 = arith.constant 12 : index
    %c0_214 = arith.constant 0 : index
    %c0_215 = arith.constant 0 : index
    %332 = vector.load %arg7[%c12_213, %c0_214, %c0_215] : memref<18x1x16xf32, #tpu.memory_space<vmem>>, vector<1x1x16xf32>
    %333 = vector.shape_cast %332 : vector<1x1x16xf32> to vector<1x16xf32>
    %334 = vector.broadcast %333 : vector<1x16xf32> to vector<8x16xf32>
    %335 = arith.addf %331, %334 : vector<8x16xf32>
    %c14 = arith.constant 14 : index
    %c0_216 = arith.constant 0 : index
    %c0_217 = arith.constant 0 : index
    %336 = vector.load %arg6[%c14, %c0_216, %c0_217] : memref<18x32x16xf32, #tpu.memory_space<vmem>>, vector<1x32x16xf32>
    %337 = vector.shape_cast %336 : vector<1x32x16xf32> to vector<32x16xf32>
    %cst_218 = arith.constant dense<0.000000e+00> : vector<8x16xf32>
    %338 = tpu.matmul %327, %337, %cst_218 {dimension_numbers = #tpu.dot_dimension_numbers<[1], [0], [0], [1], [0, 0, 1, 1], [], []>} : vector<8x32xf32>, vector<32x16xf32>, vector<8x16xf32> -> vector<8x16xf32>
    %c14_219 = arith.constant 14 : index
    %c0_220 = arith.constant 0 : index
    %c0_221 = arith.constant 0 : index
    %339 = vector.load %arg7[%c14_219, %c0_220, %c0_221] : memref<18x1x16xf32, #tpu.memory_space<vmem>>, vector<1x1x16xf32>
    %340 = vector.shape_cast %339 : vector<1x1x16xf32> to vector<1x16xf32>
    %341 = vector.broadcast %340 : vector<1x16xf32> to vector<8x16xf32>
    %342 = arith.addf %338, %341 : vector<8x16xf32>
    %c16 = arith.constant 16 : index
    %c0_222 = arith.constant 0 : index
    %c0_223 = arith.constant 0 : index
    %343 = vector.load %arg6[%c16, %c0_222, %c0_223] : memref<18x32x16xf32, #tpu.memory_space<vmem>>, vector<1x32x16xf32>
    %344 = vector.shape_cast %343 : vector<1x32x16xf32> to vector<32x16xf32>
    %cst_224 = arith.constant dense<0.000000e+00> : vector<8x16xf32>
    %345 = tpu.matmul %327, %344, %cst_224 {dimension_numbers = #tpu.dot_dimension_numbers<[1], [0], [0], [1], [0, 0, 1, 1], [], []>} : vector<8x32xf32>, vector<32x16xf32>, vector<8x16xf32> -> vector<8x16xf32>
    %c16_225 = arith.constant 16 : index
    %c0_226 = arith.constant 0 : index
    %c0_227 = arith.constant 0 : index
    %346 = vector.load %arg7[%c16_225, %c0_226, %c0_227] : memref<18x1x16xf32, #tpu.memory_space<vmem>>, vector<1x1x16xf32>
    %347 = vector.shape_cast %346 : vector<1x1x16xf32> to vector<1x16xf32>
    %348 = vector.broadcast %347 : vector<1x16xf32> to vector<8x16xf32>
    %349 = arith.addf %345, %348 : vector<8x16xf32>
    %cst_228 = arith.constant dense<0.000000e+00> : vector<8x8xf32>
    %350 = tpu.matmul %335, %342, %cst_228 {dimension_numbers = #tpu.dot_dimension_numbers<[1], [1], [0], [0], [0, 0, 1, 0], [], []>} : vector<8x16xf32>, vector<8x16xf32>, vector<8x8xf32> -> vector<8x8xf32>
    %cst_229 = arith.constant 2.500000e-01 : f32
    %351 = vector.broadcast %cst_229 : f32 to vector<8x8xf32>
    %352 = arith.mulf %350, %351 : vector<8x8xf32>
    %353 = vector.broadcast %5 : vector<1x8xf32> to vector<8x8xf32>
    %354 = arith.addf %352, %353 : vector<8x8xf32>
    %cst_230 = arith.constant dense<0xFF800000> : vector<8xf32>
    %355 = vector.multi_reduction <maximumf>, %354, %cst_230 [1] : vector<8x8xf32> to vector<8xf32>
    %356 = vector.shape_cast %355 : vector<8xf32> to vector<8x1xf32>
    %357 = vector.broadcast %356 : vector<8x1xf32> to vector<8x8xf32>
    %358 = arith.subf %354, %357 : vector<8x8xf32>
    %359 = math.exp %358 : vector<8x8xf32>
    %cst_231 = arith.constant dense<0.000000e+00> : vector<8xf32>
    %360 = vector.multi_reduction <add>, %359, %cst_231 [1] : vector<8x8xf32> to vector<8xf32>
    %361 = vector.shape_cast %360 : vector<8xf32> to vector<8x1xf32>
    %362 = tpu.reciprocal %361 {approx = true} : vector<8x1xf32> -> vector<8x1xf32>
    %363 = vector.broadcast %362 : vector<8x1xf32> to vector<8x8xf32>
    %364 = arith.mulf %359, %363 : vector<8x8xf32>
    %cst_232 = arith.constant dense<0.000000e+00> : vector<8x16xf32>
    %365 = tpu.matmul %364, %349, %cst_232 {dimension_numbers = #tpu.dot_dimension_numbers<[1], [0], [0], [1], [0, 0, 1, 1], [], []>} : vector<8x8xf32>, vector<8x16xf32>, vector<8x16xf32> -> vector<8x16xf32>
    %c4_233 = arith.constant 4 : index
    %c0_234 = arith.constant 0 : index
    %c0_235 = arith.constant 0 : index
    %366 = vector.load %arg8[%c4_233, %c0_234, %c0_235] : memref<6x16x32xf32, #tpu.memory_space<vmem>>, vector<1x16x32xf32>
    %367 = vector.shape_cast %366 : vector<1x16x32xf32> to vector<16x32xf32>
    %cst_236 = arith.constant dense<0.000000e+00> : vector<8x32xf32>
    %368 = tpu.matmul %365, %367, %cst_236 {dimension_numbers = #tpu.dot_dimension_numbers<[1], [0], [0], [1], [0, 0, 1, 1], [], []>} : vector<8x16xf32>, vector<16x32xf32>, vector<8x32xf32> -> vector<8x32xf32>
    %369 = arith.addf %328, %368 : vector<8x32xf32>
    %c13 = arith.constant 13 : index
    %c0_237 = arith.constant 0 : index
    %c0_238 = arith.constant 0 : index
    %370 = vector.load %arg6[%c13, %c0_237, %c0_238] : memref<18x32x16xf32, #tpu.memory_space<vmem>>, vector<1x32x16xf32>
    %371 = vector.shape_cast %370 : vector<1x32x16xf32> to vector<32x16xf32>
    %cst_239 = arith.constant dense<0.000000e+00> : vector<8x16xf32>
    %372 = tpu.matmul %327, %371, %cst_239 {dimension_numbers = #tpu.dot_dimension_numbers<[1], [0], [0], [1], [0, 0, 1, 1], [], []>} : vector<8x32xf32>, vector<32x16xf32>, vector<8x16xf32> -> vector<8x16xf32>
    %c13_240 = arith.constant 13 : index
    %c0_241 = arith.constant 0 : index
    %c0_242 = arith.constant 0 : index
    %373 = vector.load %arg7[%c13_240, %c0_241, %c0_242] : memref<18x1x16xf32, #tpu.memory_space<vmem>>, vector<1x1x16xf32>
    %374 = vector.shape_cast %373 : vector<1x1x16xf32> to vector<1x16xf32>
    %375 = vector.broadcast %374 : vector<1x16xf32> to vector<8x16xf32>
    %376 = arith.addf %372, %375 : vector<8x16xf32>
    %c15 = arith.constant 15 : index
    %c0_243 = arith.constant 0 : index
    %c0_244 = arith.constant 0 : index
    %377 = vector.load %arg6[%c15, %c0_243, %c0_244] : memref<18x32x16xf32, #tpu.memory_space<vmem>>, vector<1x32x16xf32>
    %378 = vector.shape_cast %377 : vector<1x32x16xf32> to vector<32x16xf32>
    %cst_245 = arith.constant dense<0.000000e+00> : vector<8x16xf32>
    %379 = tpu.matmul %327, %378, %cst_245 {dimension_numbers = #tpu.dot_dimension_numbers<[1], [0], [0], [1], [0, 0, 1, 1], [], []>} : vector<8x32xf32>, vector<32x16xf32>, vector<8x16xf32> -> vector<8x16xf32>
    %c15_246 = arith.constant 15 : index
    %c0_247 = arith.constant 0 : index
    %c0_248 = arith.constant 0 : index
    %380 = vector.load %arg7[%c15_246, %c0_247, %c0_248] : memref<18x1x16xf32, #tpu.memory_space<vmem>>, vector<1x1x16xf32>
    %381 = vector.shape_cast %380 : vector<1x1x16xf32> to vector<1x16xf32>
    %382 = vector.broadcast %381 : vector<1x16xf32> to vector<8x16xf32>
    %383 = arith.addf %379, %382 : vector<8x16xf32>
    %c17 = arith.constant 17 : index
    %c0_249 = arith.constant 0 : index
    %c0_250 = arith.constant 0 : index
    %384 = vector.load %arg6[%c17, %c0_249, %c0_250] : memref<18x32x16xf32, #tpu.memory_space<vmem>>, vector<1x32x16xf32>
    %385 = vector.shape_cast %384 : vector<1x32x16xf32> to vector<32x16xf32>
    %cst_251 = arith.constant dense<0.000000e+00> : vector<8x16xf32>
    %386 = tpu.matmul %327, %385, %cst_251 {dimension_numbers = #tpu.dot_dimension_numbers<[1], [0], [0], [1], [0, 0, 1, 1], [], []>} : vector<8x32xf32>, vector<32x16xf32>, vector<8x16xf32> -> vector<8x16xf32>
    %c17_252 = arith.constant 17 : index
    %c0_253 = arith.constant 0 : index
    %c0_254 = arith.constant 0 : index
    %387 = vector.load %arg7[%c17_252, %c0_253, %c0_254] : memref<18x1x16xf32, #tpu.memory_space<vmem>>, vector<1x1x16xf32>
    %388 = vector.shape_cast %387 : vector<1x1x16xf32> to vector<1x16xf32>
    %389 = vector.broadcast %388 : vector<1x16xf32> to vector<8x16xf32>
    %390 = arith.addf %386, %389 : vector<8x16xf32>
    %cst_255 = arith.constant dense<0.000000e+00> : vector<8x8xf32>
    %391 = tpu.matmul %376, %383, %cst_255 {dimension_numbers = #tpu.dot_dimension_numbers<[1], [1], [0], [0], [0, 0, 1, 0], [], []>} : vector<8x16xf32>, vector<8x16xf32>, vector<8x8xf32> -> vector<8x8xf32>
    %cst_256 = arith.constant 2.500000e-01 : f32
    %392 = vector.broadcast %cst_256 : f32 to vector<8x8xf32>
    %393 = arith.mulf %391, %392 : vector<8x8xf32>
    %394 = vector.broadcast %5 : vector<1x8xf32> to vector<8x8xf32>
    %395 = arith.addf %393, %394 : vector<8x8xf32>
    %cst_257 = arith.constant dense<0xFF800000> : vector<8xf32>
    %396 = vector.multi_reduction <maximumf>, %395, %cst_257 [1] : vector<8x8xf32> to vector<8xf32>
    %397 = vector.shape_cast %396 : vector<8xf32> to vector<8x1xf32>
    %398 = vector.broadcast %397 : vector<8x1xf32> to vector<8x8xf32>
    %399 = arith.subf %395, %398 : vector<8x8xf32>
    %400 = math.exp %399 : vector<8x8xf32>
    %cst_258 = arith.constant dense<0.000000e+00> : vector<8xf32>
    %401 = vector.multi_reduction <add>, %400, %cst_258 [1] : vector<8x8xf32> to vector<8xf32>
    %402 = vector.shape_cast %401 : vector<8xf32> to vector<8x1xf32>
    %403 = tpu.reciprocal %402 {approx = true} : vector<8x1xf32> -> vector<8x1xf32>
    %404 = vector.broadcast %403 : vector<8x1xf32> to vector<8x8xf32>
    %405 = arith.mulf %400, %404 : vector<8x8xf32>
    %cst_259 = arith.constant dense<0.000000e+00> : vector<8x16xf32>
    %406 = tpu.matmul %405, %390, %cst_259 {dimension_numbers = #tpu.dot_dimension_numbers<[1], [0], [0], [1], [0, 0, 1, 1], [], []>} : vector<8x8xf32>, vector<8x16xf32>, vector<8x16xf32> -> vector<8x16xf32>
    %c5_260 = arith.constant 5 : index
    %c0_261 = arith.constant 0 : index
    %c0_262 = arith.constant 0 : index
    %407 = vector.load %arg8[%c5_260, %c0_261, %c0_262] : memref<6x16x32xf32, #tpu.memory_space<vmem>>, vector<1x16x32xf32>
    %408 = vector.shape_cast %407 : vector<1x16x32xf32> to vector<16x32xf32>
    %cst_263 = arith.constant dense<0.000000e+00> : vector<8x32xf32>
    %409 = tpu.matmul %406, %408, %cst_263 {dimension_numbers = #tpu.dot_dimension_numbers<[1], [0], [0], [1], [0, 0, 1, 1], [], []>} : vector<8x16xf32>, vector<16x32xf32>, vector<8x32xf32> -> vector<8x32xf32>
    %410 = arith.addf %369, %409 : vector<8x32xf32>
    %c2_264 = arith.constant 2 : index
    %c0_265 = arith.constant 0 : index
    %c0_266 = arith.constant 0 : index
    %411 = vector.load %arg9[%c2_264, %c0_265, %c0_266] : memref<3x1x32xf32, #tpu.memory_space<vmem>>, vector<1x1x32xf32>
    %412 = vector.shape_cast %411 : vector<1x1x32xf32> to vector<1x32xf32>
    %413 = vector.broadcast %412 : vector<1x32xf32> to vector<8x32xf32>
    %414 = arith.addf %410, %413 : vector<8x32xf32>
    %415 = arith.addf %327, %414 : vector<8x32xf32>
    %c4_267 = arith.constant 4 : index
    %c0_268 = arith.constant 0 : index
    %c0_269 = arith.constant 0 : index
    %416 = vector.load %arg14[%c4_267, %c0_268, %c0_269] : memref<6x1x32xf32, #tpu.memory_space<vmem>>, vector<1x1x32xf32>
    %417 = vector.shape_cast %416 : vector<1x1x32xf32> to vector<1x32xf32>
    %c4_270 = arith.constant 4 : index
    %c0_271 = arith.constant 0 : index
    %c0_272 = arith.constant 0 : index
    %418 = vector.load %arg15[%c4_270, %c0_271, %c0_272] : memref<6x1x32xf32, #tpu.memory_space<vmem>>, vector<1x1x32xf32>
    %419 = vector.shape_cast %418 : vector<1x1x32xf32> to vector<1x32xf32>
    %cst_273 = arith.constant dense<0.000000e+00> : vector<8xf32>
    %420 = vector.multi_reduction <add>, %415, %cst_273 [1] : vector<8x32xf32> to vector<8xf32>
    %421 = vector.shape_cast %420 : vector<8xf32> to vector<8x1xf32>
    %cst_274 = arith.constant 3.200000e+01 : f32
    %422 = vector.broadcast %cst_274 : f32 to vector<8x1xf32>
    %423 = arith.divf %421, %422 : vector<8x1xf32>
    %424 = vector.broadcast %423 : vector<8x1xf32> to vector<8x32xf32>
    %425 = arith.subf %415, %424 : vector<8x32xf32>
    %426 = arith.mulf %425, %425 : vector<8x32xf32>
    %cst_275 = arith.constant dense<0.000000e+00> : vector<8xf32>
    %427 = vector.multi_reduction <add>, %426, %cst_275 [1] : vector<8x32xf32> to vector<8xf32>
    %428 = vector.shape_cast %427 : vector<8xf32> to vector<8x1xf32>
    %cst_276 = arith.constant 3.200000e+01 : f32
    %429 = vector.broadcast %cst_276 : f32 to vector<8x1xf32>
    %430 = arith.divf %428, %429 : vector<8x1xf32>
    %431 = vector.broadcast %423 : vector<8x1xf32> to vector<8x32xf32>
    %432 = arith.subf %415, %431 : vector<8x32xf32>
    %cst_277 = arith.constant 9.99999974E-6 : f32
    %433 = vector.broadcast %cst_277 : f32 to vector<8x1xf32>
    %434 = arith.addf %430, %433 : vector<8x1xf32>
    %435 = math.rsqrt %434 : vector<8x1xf32>
    %436 = vector.broadcast %435 : vector<8x1xf32> to vector<8x32xf32>
    %437 = arith.mulf %432, %436 : vector<8x32xf32>
    %438 = vector.broadcast %417 : vector<1x32xf32> to vector<8x32xf32>
    %439 = arith.mulf %437, %438 : vector<8x32xf32>
    %440 = vector.broadcast %419 : vector<1x32xf32> to vector<8x32xf32>
    %441 = arith.addf %439, %440 : vector<8x32xf32>
    %c2_278 = arith.constant 2 : index
    %c0_279 = arith.constant 0 : index
    %c0_280 = arith.constant 0 : index
    %442 = vector.load %arg10[%c2_278, %c0_279, %c0_280] : memref<3x32x64xf32, #tpu.memory_space<vmem>>, vector<1x32x64xf32>
    %443 = vector.shape_cast %442 : vector<1x32x64xf32> to vector<32x64xf32>
    %cst_281 = arith.constant dense<0.000000e+00> : vector<8x64xf32>
    %444 = tpu.matmul %441, %443, %cst_281 {dimension_numbers = #tpu.dot_dimension_numbers<[1], [0], [0], [1], [0, 0, 1, 1], [], []>} : vector<8x32xf32>, vector<32x64xf32>, vector<8x64xf32> -> vector<8x64xf32>
    %c2_282 = arith.constant 2 : index
    %c0_283 = arith.constant 0 : index
    %c0_284 = arith.constant 0 : index
    %445 = vector.load %arg11[%c2_282, %c0_283, %c0_284] : memref<3x1x64xf32, #tpu.memory_space<vmem>>, vector<1x1x64xf32>
    %446 = vector.shape_cast %445 : vector<1x1x64xf32> to vector<1x64xf32>
    %447 = vector.broadcast %446 : vector<1x64xf32> to vector<8x64xf32>
    %448 = arith.addf %444, %447 : vector<8x64xf32>
    %cst_285 = arith.constant 0.000000e+00 : f32
    %449 = vector.broadcast %cst_285 : f32 to vector<8x64xf32>
    %450 = arith.maximumf %448, %449 : vector<8x64xf32>
    %c2_286 = arith.constant 2 : index
    %c0_287 = arith.constant 0 : index
    %c0_288 = arith.constant 0 : index
    %451 = vector.load %arg12[%c2_286, %c0_287, %c0_288] : memref<3x64x32xf32, #tpu.memory_space<vmem>>, vector<1x64x32xf32>
    %452 = vector.shape_cast %451 : vector<1x64x32xf32> to vector<64x32xf32>
    %cst_289 = arith.constant dense<0.000000e+00> : vector<8x32xf32>
    %453 = tpu.matmul %450, %452, %cst_289 {dimension_numbers = #tpu.dot_dimension_numbers<[1], [0], [0], [1], [0, 0, 1, 1], [], []>} : vector<8x64xf32>, vector<64x32xf32>, vector<8x32xf32> -> vector<8x32xf32>
    %c2_290 = arith.constant 2 : index
    %c0_291 = arith.constant 0 : index
    %c0_292 = arith.constant 0 : index
    %454 = vector.load %arg13[%c2_290, %c0_291, %c0_292] : memref<3x1x32xf32, #tpu.memory_space<vmem>>, vector<1x1x32xf32>
    %455 = vector.shape_cast %454 : vector<1x1x32xf32> to vector<1x32xf32>
    %456 = vector.broadcast %455 : vector<1x32xf32> to vector<8x32xf32>
    %457 = arith.addf %453, %456 : vector<8x32xf32>
    %458 = arith.addf %441, %457 : vector<8x32xf32>
    %c5_293 = arith.constant 5 : index
    %c0_294 = arith.constant 0 : index
    %c0_295 = arith.constant 0 : index
    %459 = vector.load %arg14[%c5_293, %c0_294, %c0_295] : memref<6x1x32xf32, #tpu.memory_space<vmem>>, vector<1x1x32xf32>
    %460 = vector.shape_cast %459 : vector<1x1x32xf32> to vector<1x32xf32>
    %c5_296 = arith.constant 5 : index
    %c0_297 = arith.constant 0 : index
    %c0_298 = arith.constant 0 : index
    %461 = vector.load %arg15[%c5_296, %c0_297, %c0_298] : memref<6x1x32xf32, #tpu.memory_space<vmem>>, vector<1x1x32xf32>
    %462 = vector.shape_cast %461 : vector<1x1x32xf32> to vector<1x32xf32>
    %cst_299 = arith.constant dense<0.000000e+00> : vector<8xf32>
    %463 = vector.multi_reduction <add>, %458, %cst_299 [1] : vector<8x32xf32> to vector<8xf32>
    %464 = vector.shape_cast %463 : vector<8xf32> to vector<8x1xf32>
    %cst_300 = arith.constant 3.200000e+01 : f32
    %465 = vector.broadcast %cst_300 : f32 to vector<8x1xf32>
    %466 = arith.divf %464, %465 : vector<8x1xf32>
    %467 = vector.broadcast %466 : vector<8x1xf32> to vector<8x32xf32>
    %468 = arith.subf %458, %467 : vector<8x32xf32>
    %469 = arith.mulf %468, %468 : vector<8x32xf32>
    %cst_301 = arith.constant dense<0.000000e+00> : vector<8xf32>
    %470 = vector.multi_reduction <add>, %469, %cst_301 [1] : vector<8x32xf32> to vector<8xf32>
    %471 = vector.shape_cast %470 : vector<8xf32> to vector<8x1xf32>
    %cst_302 = arith.constant 3.200000e+01 : f32
    %472 = vector.broadcast %cst_302 : f32 to vector<8x1xf32>
    %473 = arith.divf %471, %472 : vector<8x1xf32>
    %474 = vector.broadcast %466 : vector<8x1xf32> to vector<8x32xf32>
    %475 = arith.subf %458, %474 : vector<8x32xf32>
    %cst_303 = arith.constant 9.99999974E-6 : f32
    %476 = vector.broadcast %cst_303 : f32 to vector<8x1xf32>
    %477 = arith.addf %473, %476 : vector<8x1xf32>
    %478 = math.rsqrt %477 : vector<8x1xf32>
    %479 = vector.broadcast %478 : vector<8x1xf32> to vector<8x32xf32>
    %480 = arith.mulf %475, %479 : vector<8x32xf32>
    %481 = vector.broadcast %460 : vector<1x32xf32> to vector<8x32xf32>
    %482 = arith.mulf %480, %481 : vector<8x32xf32>
    %483 = vector.broadcast %462 : vector<1x32xf32> to vector<8x32xf32>
    %484 = arith.addf %482, %483 : vector<8x32xf32>
    %c0_304 = arith.constant 0 : index
    %c0_305 = arith.constant 0 : index
    %c0_306 = arith.constant 0 : index
    %485 = vector.load %arg16[%c0_304, %c0_305, %c0_306] : memref<1x8x32xf32, #tpu.memory_space<vmem>>, vector<1x8x32xf32>
    %486 = vector.shape_cast %485 : vector<1x8x32xf32> to vector<8x32xf32>
    %487 = vector.shape_cast %484 : vector<8x32xf32> to vector<1x8x32xf32>
    tpu.vector_store %arg16[%c0_304, %c0_305, %c0_306], %487 {strides = array<i32>} : memref<1x8x32xf32, #tpu.memory_space<vmem>>, vector<1x8x32xf32>,
    return
  }
  func.func @transform_0(%arg0: i32) -> (i32, i32, i32) {
    %c0_i32 = arith.constant 0 : i32
    %c0_i32_0 = arith.constant 0 : i32
    %c0_i32_1 = arith.constant 0 : i32
    return %arg0, %c0_i32, %c0_i32_0 : i32, i32, i32
  }
  func.func @transform_1(%arg0: i32) -> (i32, i32, i32) {
    %c0_i32 = arith.constant 0 : i32
    %c0_i32_0 = arith.constant 0 : i32
    %c0_i32_1 = arith.constant 0 : i32
    return %arg0, %c0_i32, %c0_i32_0 : i32, i32, i32
  }
  func.func @transform_2(%arg0: i32) -> (i32, i32, i32) {
    %c0_i32 = arith.constant 0 : i32
    %c0_i32_0 = arith.constant 0 : i32
    %c0_i32_1 = arith.constant 0 : i32
    return %arg0, %c0_i32, %c0_i32_0 : i32, i32, i32
  }
  func.func @transform_3(%arg0: i32) -> (i32, i32, i32) {
    %c0_i32 = arith.constant 0 : i32
    %c0_i32_0 = arith.constant 0 : i32
    %c0_i32_1 = arith.constant 0 : i32
    return %arg0, %c0_i32, %c0_i32_0 : i32, i32, i32
  }
  func.func @transform_4(%arg0: i32) -> (i32, i32, i32, i32) {
    %c0_i32 = arith.constant 0 : i32
    %c0_i32_0 = arith.constant 0 : i32
    %c0_i32_1 = arith.constant 0 : i32
    %c0_i32_2 = arith.constant 0 : i32
    return %arg0, %c0_i32, %c0_i32_0, %c0_i32_1 : i32, i32, i32, i32
  }
  func.func @transform_5(%arg0: i32) -> (i32, i32, i32) {
    %c0_i32 = arith.constant 0 : i32
    %c0_i32_0 = arith.constant 0 : i32
    %c0_i32_1 = arith.constant 0 : i32
    %c0_i32_2 = arith.constant 0 : i32
    return %c0_i32, %c0_i32_0, %c0_i32_1 : i32, i32, i32
  }
  func.func @transform_6(%arg0: i32) -> (i32, i32, i32) {
    %c0_i32 = arith.constant 0 : i32
    %c0_i32_0 = arith.constant 0 : i32
    %c0_i32_1 = arith.constant 0 : i32
    %c0_i32_2 = arith.constant 0 : i32
    return %c0_i32, %c0_i32_0, %c0_i32_1 : i32, i32, i32
  }
  func.func @transform_7(%arg0: i32) -> (i32, i32, i32) {
    %c0_i32 = arith.constant 0 : i32
    %c0_i32_0 = arith.constant 0 : i32
    %c0_i32_1 = arith.constant 0 : i32
    %c0_i32_2 = arith.constant 0 : i32
    return %c0_i32, %c0_i32_0, %c0_i32_1 : i32, i32, i32
  }
  func.func @transform_8(%arg0: i32) -> (i32, i32, i32) {
    %c0_i32 = arith.constant 0 : i32
    %c0_i32_0 = arith.constant 0 : i32
    %c0_i32_1 = arith.constant 0 : i32
    %c0_i32_2 = arith.constant 0 : i32
    return %c0_i32, %c0_i32_0, %c0_i32_1 : i32, i32, i32
  }
  func.func @transform_9(%arg0: i32) -> (i32, i32, i32) {
    %c0_i32 = arith.constant 0 : i32
    %c0_i32_0 = arith.constant 0 : i32
    %c0_i32_1 = arith.constant 0 : i32
    %c0_i32_2 = arith.constant 0 : i32
    return %c0_i32, %c0_i32_0, %c0_i32_1 : i32, i32, i32
  }
  func.func @transform_10(%arg0: i32) -> (i32, i32, i32) {
    %c0_i32 = arith.constant 0 : i32
    %c0_i32_0 = arith.constant 0 : i32
    %c0_i32_1 = arith.constant 0 : i32
    %c0_i32_2 = arith.constant 0 : i32
    return %c0_i32, %c0_i32_0, %c0_i32_1 : i32, i32, i32
  }
  func.func @transform_11(%arg0: i32) -> (i32, i32, i32) {
    %c0_i32 = arith.constant 0 : i32
    %c0_i32_0 = arith.constant 0 : i32
    %c0_i32_1 = arith.constant 0 : i32
    %c0_i32_2 = arith.constant 0 : i32
    return %c0_i32, %c0_i32_0, %c0_i32_1 : i32, i32, i32
  }
  func.func @transform_12(%arg0: i32) -> (i32, i32, i32) {
    %c0_i32 = arith.constant 0 : i32
    %c0_i32_0 = arith.constant 0 : i32
    %c0_i32_1 = arith.constant 0 : i32
    %c0_i32_2 = arith.constant 0 : i32
    return %c0_i32, %c0_i32_0, %c0_i32_1 : i32, i32, i32
  }
  func.func @transform_13(%arg0: i32) -> (i32, i32, i32) {
    %c0_i32 = arith.constant 0 : i32
    %c0_i32_0 = arith.constant 0 : i32
    %c0_i32_1 = arith.constant 0 : i32
    %c0_i32_2 = arith.constant 0 : i32
    return %c0_i32, %c0_i32_0, %c0_i32_1 : i32, i32, i32
  }
  func.func @transform_14(%arg0: i32) -> (i32, i32, i32) {
    %c0_i32 = arith.constant 0 : i32
    %c0_i32_0 = arith.constant 0 : i32
    %c0_i32_1 = arith.constant 0 : i32
    %c0_i32_2 = arith.constant 0 : i32
    return %c0_i32, %c0_i32_0, %c0_i32_1 : i32, i32, i32
  }
  func.func @transform_15(%arg0: i32) -> (i32, i32, i32) {
    %c0_i32 = arith.constant 0 : i32
    %c0_i32_0 = arith.constant 0 : i32
    %c0_i32_1 = arith.constant 0 : i32
    return %arg0, %c0_i32, %c0_i32_0 : i32, i32, i32
  }
}

</mosaic_0001>

<bundles_post_ra>
// kernel: flat_lattice_backbone_forward.1
= control target key start
LH: loop header
LB: loop body
LE: loop exit
PB: predicated region body
PF: predicated region fallthrough
CT: control target
= control target key end

     0   :  { %s6454_s0 = inlined_call_operand.vmem [shape: f32[2,8,32], index: 0, kind: input, shape index: {}]   ;;  %s6455_s1 = inlined_call_operand.vmem [shape: f32[2,8,32], index: 1, kind: input, shape index: {}]   ;;  %s6456_s2 = inlined_call_operand.vmem [shape: f32[2,1,8], index: 2, kind: input, shape index: {}]   ;;  %s6457_s3 = inlined_call_operand.vmem [shape: f32[2,1,8], index: 3, kind: input, shape index: {}]   ;;  %s6458_s4 = inlined_call_operand.vmem [shape: f32[2,2,8,8], index: 4, kind: input, shape index: {}]   ;;  %s6459_s5 = inlined_call_operand.vmem [shape: f32[18,32,16], index: 5, kind: input, shape index: {}]   ;;  %s6460_s6 = inlined_call_operand.vmem [shape: f32[18,1,16], index: 6, kind: input, shape index: {}]   ;;  %s6461_s7 = inlined_call_operand.vmem [shape: f32[6,16,32], index: 7, kind: input, shape index: {}]   ;;  %s6462_s8 = inlined_call_operand.vmem [shape: f32[3,1,32], index: 8, kind: input, shape index: {}]   ;;  %s6463_s9 = inlined_call_operand.vmem [shape: f32[3,32,64], index: 9, kind: input, shape index: {}]   ;;  %s6464_s10 = inlined_call_operand.vmem [shape: f32[3,1,64], index: 10, kind: input, shape index: {}]   ;;  %s6465_s11 = inlined_call_operand.vmem [shape: f32[3,64,32], index: 11, kind: input, shape index: {}]   ;;  %s6466_s12 = inlined_call_operand.vmem [shape: f32[3,1,32], index: 12, kind: input, shape index: {}]   ;;  %s6467_s13 = inlined_call_operand.vmem [shape: f32[6,1,32], index: 13, kind: input, shape index: {}]   ;;  %s6468_s14 = inlined_call_operand.vmem [shape: f32[6,1,32], index: 14, kind: input, shape index: {}]   ;;  %s6469_s15 = inlined_call_operand.hbm [shape: f32[2,8,32], index: 15, kind: output, shape index: {}]  }
   0x1   :  { %6475 = sst [smem:[#allocation9_spill]] %s6454_s0 }
   0x2   :  { %6476 = sst [smem:[#allocation10_spill]] %s6456_s2 }
   0x3   :  { %20 = vsyncpa [#allocation3], 0 }
   0x4   :  { %22 = vsyncpa [#allocation3 + $0x1], 0  ;;  %s5581_s18 = smov 0   ;;  %s5583_s19 = smov 0  }
   0x5   :  { %s5585_s20 = smov 0   ;;  %s5587_s21 = smov 0  }
   0x6 LB: > { %6477 = sst [smem:[#allocation5_spill]] %s5491_s20  ;;  %s5602_s22 = sadd.s32 4294967295, %s5495_s21   ;;  %s5495_s21 = sphi %s5587_s21, %s6487_s21   ;;  %s5491_s20 = sphi %s5585_s20, %s6489_s20   ;;  %s5487_s19 = sphi %s5583_s19, %s6491_s19   ;;  %s5483_s18 = sphi %s5581_s18, %s6490_s18  }
   0x7   : > { %s4371_s23 = sadd.s32 4294967294, %s5495_s21   ;;  %s5606_s24 = sadd.s32 1, %s5495_s21  }
   0x8   : > { %6478 = sst [smem:[#allocation6_spill]] %s5606_s24  ;;  %s375_s25 = sadd.s32 1, %s5491_s20 }
   0x9   : > { %s372_s26 = ssub.s32 %s5495_s21, %s5606_s24  ;;  %p385_p0 = scmp.ne.s32.totalorder %s5491_s20, %s5487_s19 }
   0xa   : > { %p373_p1 = scmp.eq.s32.totalorder %s372_s26, 0  ;;  %p386_p2 = scmp.eq.s32.totalorder %s5602_s22, 1 }
   0xb   : > { %p391_p3 = scmp.ne.s32.totalorder %s5487_s19, %s5483_s18  ;;  %p392_p4 = scmp.eq.s32.totalorder %s4371_s23, 1 }
   0xc   : > { %s5617_s27 = scalar_select %p373_p1, %s5491_s20, %s375_s25  }
   0xd   : > { %p5619_p5 = por %p386_p2, %p385_p0  ;;  %p5623_p6 = por %p392_p4, %p391_p3 }
   0xe   : > { %6479 = sst [smem:[#allocation7_spill]] %s5617_s27  ;;  %p4374_p7 = scmp.ge.s32.totalorder %s5495_s21, 1 }
   0xf   : > { %s6481_s29 = scalar_select %p5623_p6, 1, 0 }
  0x10   : > { %p474_p8 = scmp.lt.s32.totalorder %s5495_s21, 3 }
  0x11   : > { %6482 = sst [smem:[#allocation8_spill]] %s6481_s29 }
  0x12   : > { %p475_p9 = pnand %p4374_p7, %p474_p8 }
  0x13   : > { %v4382_v0 = vld [vmem:[%s6459_s5 + $0x40] sm:$0xff] (!%p475_p9)  ;;  %v4383_v1 = vld [vmem:[%s6459_s5 + $0x48] sm:$0xff] (!%p475_p9)  ;;  %v5497_v3 = vmov (!%p475_p9), 0.0|0.0   ;;  %v4384_v6 = vld [vmem:[%s6459_s5 + $0x50] sm:$0xff] (!%p475_p9)  ;;  %p536_p10 = scmp.lt.s32.totalorder (!%p475_p9), %s5602_s22, 1  ;;  %vm5498_vm0 = vmmov (!%p475_p9), 0  }
  0x14   : > { %478 = sbr.rel (%p475_p9) target bundleno = 9036 (0x234c), region = 80  ;;  %v559_v2 = vld [vmem:[%s6459_s5] sm:$0xff] (!%p475_p9)  ;;  %5180 = vmatprep.subr.bf16.mxu1 (!%p475_p9), %v5497_v3  ;;  %v5181_v4 = vpack.c.bf16 (!%p475_p9), %v4383_v1, %v4382_v0  ;;  %5174 = vmatprep.subr.bf16.mxu0 (!%p475_p9), %v5497_v3  ;;  %v560_v5 = vld [vmem:[%s6459_s5 + $0x8] sm:$0xff] (!%p475_p9)  ;;  %v4385_v7 = vld [vmem:[%s6459_s5 + $0x58] sm:$0xff] (!%p475_p9)  ;;  %v5499_v11 = vmov (!%p475_p9), 0.0   ;;  %s6483_s0 = sld [smem:[#allocation9_spill]] (!%p475_p9) }
  0x15   : > { %v5175_v8 = vpack.c.bf16 (!%p475_p9), %v560_v5, %v559_v2  ;;  %v561_v9 = vld [vmem:[%s6459_s5 + $0x10] sm:$0xff] (!%p475_p9)  ;;  %v562_v10 = vld [vmem:[%s6459_s5 + $0x18] sm:$0xff] (!%p475_p9)  ;;  %4803 = vmatprep.mubr.msk.f32.mxu1 (!%p475_p9), %vm5498_vm0, %v5499_v11  ;;  %4792 = vmatprep.mubr.msk.f32.mxu0 (!%p475_p9), %vm5498_vm0, %v5499_v11  ;;  %v5184_v12 = vpack.c.bf16 (!%p475_p9), %v4385_v7, %v4384_v6  ;;  %v4389_v14 = vld [vmem:[%s6459_s5 + $0x80] sm:$0xff] (!%p475_p9)  ;;  %vm570_vm1 = vcmask (!%p475_p9), 261120   ;;  %vm810_vm2 = vcmask (!%p475_p9), 130048   ;;  %s6484_s2 = sld [smem:[#allocation10_spill]] (!%p475_p9) }
  0x16   : > { %5182 = vmatpush3.bf16.msra.mxu1 (!%p475_p9), %v5181_v4  ;;  %v5178_v13 = vpack.c.bf16 (!%p475_p9), %v562_v10, %v561_v9  ;;  %v4390_v15 = vld [vmem:[%s6459_s5 + $0x88] sm:$0xff] (!%p475_p9)  ;;  %v4391_v18 = vld [vmem:[%s6459_s5 + $0x90] sm:$0xff] (!%p475_p9)  ;;  %v4392_v19 = vld [vmem:[%s6459_s5 + $0x98] sm:$0xff] (!%p475_p9)  ;;  %vm895_vm3 = vcmask (!%p475_p9), 64512   ;;  %vm1681_vm4 = vcmask (!%p475_p9), 523264  }
  0x17   : > { %5176 = vmatpush3.bf16.msra.mxu0 (!%p475_p9), %v5175_v8  ;;  %5183 = vmatprep.subr.bf16.mxu1 (!%p475_p9), %v5497_v3  ;;  %v5187_v17 = vpack.c.bf16 (!%p475_p9), %v4390_v15, %v4389_v14  ;;  %v5190_v20 = vpack.c.bf16 (!%p475_p9), %v4392_v19, %v4391_v18  ;;  %v4387_v21 = vld [vmem:[%s6460_s6 + $0x2] ss:$0 sm:$0xff] (!%p475_p9)  ;;  %v4380_v22 = vld [vmem:[%s6460_s6] ss:$0 sm:$0xff] (!%p475_p9)  ;;  %v4394_v29 = vld [vmem:[%s6460_s6 + $0x4] ss:$0 sm:$0xff] (!%p475_p9) }
  0x18   : > { %5177 = vmatprep.subr.bf16.mxu0 (!%p475_p9), %v5497_v3  ;;  %v4400_v44 = vld [vmem:[%s6459_s5 + $0x20] sm:$0xff] (!%p475_p9)  ;;  %v4401_v45 = vld [vmem:[%s6459_s5 + $0x28] sm:$0xff] (!%p475_p9)  ;;  %v4402_v47 = vld [vmem:[%s6459_s5 + $0x30] sm:$0xff] (!%p475_p9) }
  0x19   : > { %v5193_v46 = vpack.c.bf16 (!%p475_p9), %v4401_v45, %v4400_v44  ;;  %v4403_v48 = vld [vmem:[%s6459_s5 + $0x38] sm:$0xff] (!%p475_p9)  ;;  %v4407_v51 = vld [vmem:[%s6459_s5 + $0x60] sm:$0xff] (!%p475_p9)  ;;  %v4408_v52 = vld [vmem:[%s6459_s5 + $0x68] sm:$0xff] (!%p475_p9) }
  0x1a   : > { %5185 = vmatpush3.bf16.msra.mxu1 (!%p475_p9), %v5184_v12  ;;  %v5196_v49 = vpack.c.bf16 (!%p475_p9), %v4403_v48, %v4402_v47  ;;  %v5199_v54 = vpack.c.bf16 (!%p475_p9), %v4408_v52, %v4407_v51  ;;  %v4409_v56 = vld [vmem:[%s6459_s5 + $0x70] sm:$0xff] (!%p475_p9)  ;;  %v4410_v57 = vld [vmem:[%s6459_s5 + $0x78] sm:$0xff] (!%p475_p9)  ;;  %v4412_v63 = vld [vmem:[%s6460_s6 + $0x3] ss:$0 sm:$0xff] (!%p475_p9) }
  0x1b   : > { %s5661_s20 = scalar_select %p536_p10, %s5602_s22, 1  ;;  %5179 = vmatpush3.bf16.msra.mxu0 %v5178_v13  ;;  %4822 = vmatprep.subr.mxu1 %v5499_v11  ;;  %v5202_v58 = vpack.c.bf16 %v4410_v57, %v4409_v56  ;;  %v4405_v0 = vld [vmem:[%s6460_s6 + $0x1] ss:$0 sm:$0xff]  ;;  %v4415_v7 = vld [vmem:[%s6459_s5 + $0xa8] sm:$0xff]  ;;  %v4416_v8 = vld [vmem:[%s6459_s5 + $0xb0] sm:$0xff] }
  0x1c   : > { %5186 = vmatprep.subr.bf16.mxu0 %v5497_v3  ;;  %v4414_v6 = vld [vmem:[%s6459_s5 + $0xa0] sm:$0xff]  ;;  %v4417_v10 = vld [vmem:[%s6459_s5 + $0xb8] sm:$0xff] }
  0x1d   : > { %s6474_s24 = sshll.u32 %s5661_s20, 3  ;;  %s5720_s16 = scalar_lea.vmem %s6484_s2, %s5661_s20  ;;  %v5205_v9 = vpack.c.bf16 %v4415_v7, %v4414_v6  ;;  %v5208_v12 = vpack.c.bf16 %v4417_v10, %v4416_v8  ;;  %v1584_v56 = vld [vmem:[%s6463_s9 + $0x18] sm:$0xff]  ;;  %v4429_v8 = vld [vmem:[%s6467_s13] ss:$0 sm:$0xff] }
  0x1e   : > { %s539_s25 = scalar_lea.vmem %s6483_s0, %s6474_s24  ;;  %v5723_v34 = vld [vmem:[%s5720_s16] ss:$0 sm:$0xff]  ;;  %s4609_s29 = sshll.u32 %s5661_s20, 4 }
  0x1f   : > { %v5677_v16 = vld [vmem:[%s539_s25] sm:$0xff]  ;;  %s6485_s25 = sshll.u32 %s5661_s20, 3  ;;  %s549_s23 = scalar_lea.vmem %s6457_s3, %s5661_s20 }
  0x20   : > { %4804 = vmatmul.mubr.msk.f32.vlgmr.msra.gmra.mrb[0].mxu1 %vm570_vm1, %v5677_v16  ;;  %4793 = vmatmul.mubr.msk.f32.vlgmr.msra.gmra.mrb[0].mxu0 %vm570_vm1, %v5677_v16  ;;  %v4430_v10 = vld [vmem:[%s6468_s14] ss:$0 sm:$0xff]  ;;  %s543_s27 = scalar_lea.vmem %s6455_s1, %s6485_s25  ;;  %s6000_s25 = scalar_lea.vmem %s6458_s4, %s4609_s29 }
  0x21   : > { %4824 = vmatprep.mubr.msk.f32.mxu1 %vm5498_vm0, %v5499_v11  ;;  %5188 = vmatpush3.bf16.msra.mxu0 %v5187_v17  ;;  %s4606_s0 = sshll.u32 %s5602_s22, 7  ;;  %s5500_s22 = smov [#allocation2]  }
  0x22   : > { %4814 = vmatprep.mubr.msk.f32.mxu0 %vm5498_vm0, %v5499_v11  ;;  %5189 = vmatprep.subr.bf16.mxu0 %v5497_v3 }
  0x25   : > { %5191 = vmatpush3.bf16.msra.mxu0 %v5190_v20 }
  0x26   : > { %4817 = vmatprep.subr.mxu0 %v5499_v11 }
  0x28   : > { %4815 = vmatmul.mubr.msk.f32.vlgmr.msra.gmra.mrb[2].mxu0 %vm570_vm1, %v5677_v16 }
  0x29   : > { %4819 = vmatprep.mubr.msk.f32.mxu0 %vm5498_vm0, %v5499_v11 }
  0xf3   : > { %v723_v23 = vpop.f32.mrb[0].mxu1  ;;  %v640_v26 = vpop.f32.mrb[0].mxu0 }
  0xf4   : > { %v724_v24 = vadd.f32 %v4387_v21, %v723_v23  ;;  %v4805_v25 = vpop.f32.mrb[1].mxu1  ;;  %v641_v27 = vadd.f32 %v4380_v22, %v640_v26  ;;  %v4794_v28 = vpop.f32.mrb[1].mxu0 }
  0xf5   : > { %v4419_v25 = vld [vmem:[%s6460_s6 + $0x5] ss:$0 sm:$0xff]  ;;  %v4424_v28 = vld [vmem:[%s6461_s7 + $0x10] sm:$0xff] }
  0xf6   : > { %4818 = vmatpush3.xpose.msk.msra.mxu0 %vm810_vm2, %v724_v24 }
  0xf7   : > { %5192 = vmatprep.subr.bf16.mxu0 %v5497_v3 }
  0xf9   : > { %4820 = vmatmul.mubr.msk.f32.vlgmr.msra.gmra.mrb[4].mxu0 %vm810_vm2, %v641_v27 }
  0xfa   : > { %4835 = vmatprep.mubr.msk.f32.mxu0 %vm5498_vm0, %v5499_v11  ;;  %5194 = vmatpush3.bf16.msra.mxu0 %v5193_v46 }
  0xfb   : > { %v806_v30 = vpop.f32.mrb[2].mxu0  ;;  %5195 = vmatprep.subr.bf16.mxu0 %v5497_v3 }
  0xfc   : > { %v807_v31 = vadd.f32 %v4394_v29, %v806_v30  ;;  %v4816_v32 = vpop.f32.mrb[3].mxu0  ;;  %v4425_v29 = vld [vmem:[%s6461_s7 + $0x18] sm:$0xff] }
  0xfd   : > { %v5211_v30 = vpack.c.bf16 %v4425_v29, %v4424_v28  ;;  %v980_v32 = vld [vmem:[%s6461_s7] sm:$0xff] }
  0xfe   : > { %4823 = vmatpush3.msra.mxu1 %v807_v31  ;;  %5197 = vmatpush3.bf16.msra.mxu0 %v5196_v49 }
  0xff   : > { %5198 = vmatprep.subr.bf16.mxu1 %v5497_v3  ;;  %5204 = vmatprep.subr.bf16.mxu0 %v5497_v3 }
 0x101   : > { %4836 = vmatmul.mubr.msk.f32.vlgmr.msra.gmra.mrb[6].mxu0 %vm570_vm1, %v5677_v16 }
 0x102   : > { %4857 = vmatprep.mubr.msk.f32.mxu0 %vm5498_vm0, %v5499_v11  ;;  %5206 = vmatpush3.bf16.msra.mxu0 %v5205_v9 }
 0x103   : > { %5207 = vmatprep.subr.bf16.mxu0 %v5497_v3 }
 0x106   : > { %5209 = vmatpush3.bf16.msra.mxu0 %v5208_v12 }
 0x107   : > { %5210 = vmatprep.subr.bf16.mxu0 %v5497_v3 }
 0x109   : > { %4858 = vmatmul.mubr.msk.f32.vlgmr.msra.gmra.mrb[8].mxu0 %vm570_vm1, %v5677_v16 }
 0x10a   : > { %4874 = vmatprep.mubr.msk.f32.mxu0 %vm5498_vm0, %v5499_v11  ;;  %5212 = vmatpush3.bf16.msra.mxu0 %v5211_v30 }
 0x10b   : > { %5216 = vmatprep.subr.bf16.mxu0 %v5497_v3 }
 0x1cc   : > { %v883_v33 = vpop.f32.mrb[4].mxu0 }
 0x1cd   : > { %v887_v35 = vmul.f32 0.25, %v883_v33  ;;  %v4821_v36 = vpop.f32.mrb[5].mxu0  ;;  %v981_v33 = vld [vmem:[%s6461_s7 + $0x8] sm:$0xff] }
 0x1cf   : > { %v894_v37 = vadd.f32 %v5723_v34, %v887_v35  ;;  %v5214_v35 = vpack.c.bf16 %v981_v33, %v980_v32 }
 0x1d1   : > { %v896_v38 = vsel %vm895_vm3, %v894_v37, -inf }
 0x1d2   : > { %897 = vmax.xlane.f32.xlu0 %v896_v38 }
 0x1d4   : > { %v1061_v59 = vpop.f32.mrb[6].mxu0 }
 0x1d5   : > { %v4837_v60 = vpop.f32.mrb[7].mxu0  ;;  %v1062_v5 = vadd.f32 %v4405_v0, %v1061_v59  ;;  %v1667_v59 = vld [vmem:[%s6465_s11 + $0x8] sm:$0xff]  ;;  %v1670_v0 = vld [vmem:[%s6465_s11 + $0x20] sm:$0xff] }
 0x1d6   : > { %v1668_v60 = vld [vmem:[%s6465_s11 + $0x10] sm:$0xff] }
 0x1dc   : > { %v1227_v24 = vpop.f32.mrb[8].mxu0 }
 0x1dd   : > { %v4859_v26 = vpop.f32.mrb[9].mxu0  ;;  %v1228_v27 = vadd.f32 %v4419_v25, %v1227_v24 }
 0x25f   : > { %v898_v39 = vpop.xlane.xlu0 %897 }
 0x260   : > { %v899_v40 = vsub.f32 %v894_v37, %v898_v39 }
 0x262   : > { %v900_v41 = vmul.f32 1.442695, %v899_v40 }
 0x264   : > { %5396 = vpow2.f32 %v900_v41 }
 0x26e   : > { %v5397_v42 = vpop.eup %5396 }
 0x26f   : > { %v902_v43 = vsel %vm895_vm3, %v5397_v42, 0.0 }
 0x270   : > { %903 = vadd.xlane.f32.xlu0 %v902_v43 }
 0x2fd   : > { %v904_v50 = vpop.xlane.xlu0 %903 }
 0x2fe   : > { %5398 = vrcp.f32 %v904_v50 }
 0x308   : > { %v5399_v53 = vpop.eup %5398 }
 0x309   : > { %v906_v55 = vmul.f32 %v5399_v53, %v5397_v42  ;;  %v4428_v42 = vld [vmem:[%s6462_s8] ss:$0 sm:$0xff] }
 0x30a   : > { %v1581_v53 = vld [vmem:[%s6463_s9] sm:$0xff] }
 0x30b   : > { %4825 = vmatmul.mubr.msk.f32.vlgmr.msra.gmra.mrb[2].mxu1 %vm895_vm3, %v906_v55 }
 0x30c   : > { %5200 = vmatpush3.bf16.msra.mxu1 %v5199_v54  ;;  %4846 = vmatprep.mubr.msk.f32.mxu1 %vm5498_vm0, %v5499_v11  ;;  %v1582_v54 = vld [vmem:[%s6463_s9 + $0x8] sm:$0xff] }
 0x30d   : > { %5201 = vmatprep.subr.bf16.mxu1 %v5497_v3  ;;  %v5217_v55 = vpack.c.bf16 %v1582_v54, %v1581_v53  ;;  %v4449_v53 = vld [vmem:[%s6459_s5 + $0x118] sm:$0xff] }
 0x310   : > { %5203 = vmatpush3.bf16.msra.mxu1 %v5202_v58  ;;  %v1666_v58 = vld [vmem:[%s6465_s11] sm:$0xff] }
 0x311   : > { %4860 = vmatprep.subr.mxu1 %v5499_v11 }
 0x313   : > { %4847 = vmatmul.mubr.msk.f32.vlgmr.msra.gmra.mrb[4].mxu1 %vm570_vm1, %v5677_v16 }
 0x314   : > { %4862 = vmatprep.mubr.msk.f32.mxu1 %vm5498_vm0, %v5499_v11 }
 0x3de   : > { %v976_v61 = vpop.f32.mrb[2].mxu1 }
 0x3df   : > { %v4826_v62 = vpop.f32.mrb[3].mxu1 }
 0x3e0   : > { %v1669_v62 = vld [vmem:[%s6465_s11 + $0x18] sm:$0xff] }
 0x3e6   : > { %v1144_v1 = vpop.f32.mrb[4].mxu1 }
 0x3e7   : > { %v1145_v2 = vadd.f32 %v4412_v63, %v1144_v1  ;;  %v4848_v4 = vpop.f32.mrb[5].mxu1  ;;  %v5226_v63 = vpack.c.bf16 %v1669_v62, %v1668_v60  ;;  %v1671_v1 = vld [vmem:[%s6465_s11 + $0x28] sm:$0xff] }
 0x3e8   : > { %v4467_v60 = vld [vmem:[%s6459_s5 + $0xe8] sm:$0xff] }
 0x3e9   : > { %4861 = vmatpush3.xpose.msk.msra.mxu1 %vm810_vm2, %v1145_v2  ;;  %v5229_v2 = vpack.c.bf16 %v1671_v1, %v1670_v0 }
 0x3ea   : > { %4865 = vmatprep.subr.mxu1 %v5499_v11 }
 0x3ec   : > { %4863 = vmatmul.mubr.msk.f32.vlgmr.msra.gmra.mrb[6].mxu1 %vm810_vm2, %v1062_v5 }
 0x3ed   : > { %4867 = vmatprep.mubr.msk.f32.mxu1 %vm5498_vm0, %v5499_v11  ;;  %4866 = vmatpush3.msra.mxu1 %v1228_v27 }
 0x3ee   : > { %5213 = vmatprep.subr.bf16.mxu1 %v5497_v3 }
 0x4bf   : > { %v1303_v13 = vpop.f32.mrb[6].mxu1 }
 0x4c0   : > { %v1307_v14 = vmul.f32 0.25, %v1303_v13  ;;  %v4864_v15 = vpop.f32.mrb[7].mxu1 }
 0x4c1   : > { %v1673_v15 = vld [vmem:[%s6465_s11 + $0x38] sm:$0xff] }
 0x4c2   : > { %v1308_v17 = vadd.f32 %v5723_v34, %v1307_v14  ;;  %v1672_v14 = vld [vmem:[%s6465_s11 + $0x30] sm:$0xff] }
 0x4c4   : > { %v1309_v18 = vsel %vm895_vm3, %v1308_v17, -inf }
 0x4c5   : > { %1310 = vmax.xlane.f32.xlu1 %v1309_v18  ;;  %v4431_v18 = vld [vmem:[%s6464_s10] ss:$0 sm:$0xff] }
 0x552   : > { %v1311_v19 = vpop.xlane.xlu1 %1310 }
 0x553   : > { %v1312_v20 = vsub.f32 %v1308_v17, %v1311_v19  ;;  %v5232_v17 = vpack.c.bf16 %v1673_v15, %v1672_v14 }
 0x555   : > { %v1313_v21 = vmul.f32 1.442695, %v1312_v20 }
 0x557   : > { %5400 = vpow2.f32 %v1313_v21 }
 0x561   : > { %v5401_v22 = vpop.eup %5400 }
 0x562   : > { %v1315_v23 = vsel %vm895_vm3, %v5401_v22, 0.0 }
 0x563   : > { %1316 = vadd.xlane.f32.xlu1 %v1315_v23  ;;  %v4433_v23 = vld [vmem:[%s6466_s12] ss:$0 sm:$0xff] }
 0x5f0   : > { %v1317_v31 = vpop.xlane.xlu1 %1316 }
 0x5f1   : > { %5402 = vrcp.f32 %v1317_v31 }
 0x5fb   : > { %v5403_v34 = vpop.eup %5402 }
 0x5fc   : > { %v1319_v36 = vmul.f32 %v5403_v34, %v5401_v22  ;;  %v4439_v34 = vld [vmem:[%s6459_s5 + $0xc0] sm:$0xff] }
 0x5fe   : > { %4868 = vmatmul.mubr.msk.f32.vlgmr.msra.gmra.mrb[8].mxu1 %vm895_vm3, %v1319_v36 }
 0x5ff   : > { %5215 = vmatpush3.bf16.msra.mxu1 %v5214_v35  ;;  %4881 = vmatprep.mubr.msk.f32.mxu1 %vm5498_vm0, %v5499_v11  ;;  %v4440_v35 = vld [vmem:[%s6459_s5 + $0xc8] sm:$0xff] }
 0x600   : > { %5222 = vmatprep.subr.bf16.mxu1 %v5497_v3  ;;  %v5235_v36 = vpack.c.bf16 %v4440_v35, %v4439_v34  ;;  %v4473_v34 = vld [vmem:[%s6459_s5 + $0x120] sm:$0xff]  ;;  %v4474_v35 = vld [vmem:[%s6459_s5 + $0x128] sm:$0xff] }
 0x602   : > { %4882 = vmatmul.mubr.msk.f32.vlgmr.msra.gmra.mrb[10].mxu1 %vm810_vm2, %v976_v61  ;;  %v5223_v61 = vpack.c.bf16 %v1667_v59, %v1666_v58  ;;  %v4466_v59 = vld [vmem:[%s6459_s5 + $0xe0] sm:$0xff] }
 0x603   : > { %4911 = vmatprep.mubr.msk.f32.mxu1 %vm5498_vm0, %v5499_v11  ;;  %v5253_v0 = vpack.c.bf16 %v4467_v60, %v4466_v59  ;;  %v4489_v60 = vld [vmem:[%s6000_s25 + $0x8] sm:$0xff] }
 0x604   : > { %5224 = vmatpush3.bf16.msra.mxu1 %v5223_v61  ;;  %v4444_v61 = vld [vmem:[%s6460_s6 + $0x6] ss:$0 sm:$0xff] }
 0x605   : > { %5225 = vmatprep.subr.bf16.mxu1 %v5497_v3 }
 0x608   : > { %5227 = vmatpush3.bf16.msra.mxu1 %v5226_v63 }
 0x609   : > { %5228 = vmatprep.subr.bf16.mxu1 %v5497_v3 }
 0x60c   : > { %5230 = vmatpush3.bf16.msra.mxu1 %v5229_v2  ;;  %v4468_v2 = vld [vmem:[%s6459_s5 + $0xf0] sm:$0xff] }
 0x60d   : > { %5231 = vmatprep.subr.bf16.mxu1 %v5497_v3 }
 0x610   : > { %5233 = vmatpush3.bf16.msra.mxu1 %v5232_v17 }
 0x611   : > { %5246 = vmatprep.subr.bf16.mxu1 %v5497_v3 }
 0x6d1   : > { %v1389_v37 = vpop.f32.mrb[8].mxu1 }
 0x6d2   : > { %v4869_v38 = vpop.f32.mrb[9].mxu1  ;;  %4875 = vmatmul.mubr.msk.f32.vlgmr.msra.gmra.mrb[10].mxu0 %vm810_vm2, %v1389_v37  ;;  %v4441_v37 = vld [vmem:[%s6459_s5 + $0xd0] sm:$0xff] }
 0x6d3   : > { %4892 = vmatprep.mubr.msk.f32.mxu0 %vm5498_vm0, %v5499_v11  ;;  %5218 = vmatpush3.bf16.msra.mxu0 %v5217_v55  ;;  %v4442_v38 = vld [vmem:[%s6459_s5 + $0xd8] sm:$0xff]  ;;  %v5938_v55 = vld [vmem:[%s543_s27] sm:$0xff]  ;;  %s6411_s27 = scalar_lea.hbm %s6469_s15, %s4606_s0 }
 0x6d4   : > { %5219 = vmatprep.subr.bf16.mxu0 %v5497_v3 }
 0x6d5   : > { %v1538_v39 = vpop.f32.mrb[10].mxu1 }
 0x6d6   : > { %v4883_v40 = vpop.f32.mrb[11].mxu1 }
 0x7a5   : > { %v1465_v41 = vpop.f32.mrb[10].mxu0 }
 0x7a6   : > { %v1539_v43 = vadd.f32 %v1538_v39, %v1465_v41  ;;  %v4876_v44 = vpop.f32.mrb[11].mxu0  ;;  %v5238_v39 = vpack.c.bf16 %v4442_v38, %v4441_v37  ;;  %v5259_v37 = vpack.c.bf16 %v4474_v35, %v4473_v34 }
 0x7a7   : > { %v4437_v44 = vld [vmem:[%s6467_s13 + $0x1] ss:$0 sm:$0xff] }
 0x7a8   : > { %v1549_v45 = vadd.f32 %v4428_v42, %v1539_v43 }
 0x7aa   : > { %v1550_v46 = vadd.f32 %v1549_v45, %v5677_v16  ;;  %v1583_v16 = vld [vmem:[%s6463_s9 + $0x10] sm:$0xff] }
 0x7ab   : > { %v5220_v57 = vpack.c.bf16 %v1584_v56, %v1583_v16 }
 0x7ac   : > { %v1553_v47 = vsel %vm570_vm1, %v1550_v46, 0.0 }
 0x7ad   : > { %1554 = vadd.xlane.f32.xlu0 %v1553_v47  ;;  %5221 = vmatpush3.bf16.msra.mxu0 %v5220_v57  ;;  %v4447_v47 = vld [vmem:[%s6459_s5 + $0x108] sm:$0xff] }
 0x7ae   : > { %5234 = vmatprep.subr.bf16.mxu0 %v5497_v3  ;;  %v4451_v57 = vld [vmem:[%s6460_s6 + $0x8] ss:$0 sm:$0xff] }
 0x83a   : > { %v1555_v48 = vpop.xlane.xlu0 %1554 }
 0x83b   : > { %v1557_v49 = vmul.f32 0.03125, %v1555_v48  ;;  %v4438_v48 = vld [vmem:[%s6468_s14 + $0x1] ss:$0 sm:$0xff] }
 0x83d   : > { %v1558_v50 = vsub.f32 %v1550_v46, %v1557_v49  ;;  %v4446_v46 = vld [vmem:[%s6459_s5 + $0x100] sm:$0xff] }
 0x83f   : > { %v1559_v51 = vmul.f32 %v1558_v50, %v1558_v50 }
 0x841   : > { %v1560_v52 = vsel %vm570_vm1, %v1559_v51, 0.0 }
 0x842   : > { %1561 = vadd.xlane.f32.xlu1 %v1560_v52  ;;  %v4448_v52 = vld [vmem:[%s6459_s5 + $0x110] sm:$0xff] }
 0x843   : > { %v5244_v54 = vpack.c.bf16 %v4449_v53, %v4448_v52  ;;  %v4481_v52 = vld [vmem:[%s6459_s5 + $0x168] sm:$0xff]  ;;  %v4482_v53 = vld [vmem:[%s6459_s5 + $0x170] sm:$0xff] }
 0x8cf   : > { %v1562_v4 = vpop.xlane.xlu1 %1561 }
 0x8d0   : > { %v1563_v5 = vmul.f32 0.03125, %v1562_v4  ;;  %v4469_v4 = vld [vmem:[%s6459_s5 + $0xf8] sm:$0xff] }
 0x8d2   : > { %v1564_v6 = vadd.f32 1e-05, %v1563_v5  ;;  %v5256_v5 = vpack.c.bf16 %v4469_v4, %v4468_v2 }
 0x8d4   : > { %5404 = vrsqrt.f32 %v1564_v6  ;;  %v4453_v6 = vld [vmem:[%s6459_s5 + $0x140] sm:$0xff] }
 0x8de   : > { %v5405_v7 = vpop.eup %5404 }
 0x8df   : > { %v1566_v9 = vmul.f32 %v5405_v7, %v1558_v50  ;;  %v5241_v50 = vpack.c.bf16 %v4447_v47, %v4446_v46  ;;  %v4454_v7 = vld [vmem:[%s6459_s5 + $0x148] sm:$0xff]  ;;  %v4471_v46 = vld [vmem:[%s6460_s6 + $0x7] ss:$0 sm:$0xff] }
 0x8e1   : > { %v1573_v12 = vmul.f32 %v4429_v8, %v1566_v9  ;;  %v4455_v8 = vld [vmem:[%s6459_s5 + $0x150] sm:$0xff]  ;;  %v5247_v9 = vpack.c.bf16 %v4454_v7, %v4453_v6  ;;  %v4485_v6 = vld [vmem:[%s6460_s6 + $0xb] ss:$0 sm:$0xff] }
 0x8e3   : > { %v1580_v13 = vadd.f32 %v4430_v10, %v1573_v12  ;;  %v4456_v10 = vld [vmem:[%s6459_s5 + $0x158] sm:$0xff] }
 0x8e4   : > { %v5250_v12 = vpack.c.bf16 %v4456_v10, %v4455_v8  ;;  %v4492_v10 = vld [vmem:[%s6461_s7 + $0x38] sm:$0xff] }
 0x8e5   : > { %4893 = vmatmul.mubr.msk.f32.vlgmr.msra.gmra.mrb[12].mxu0 %vm570_vm1, %v1580_v13 }
 0x8e6   : > { %4922 = vmatprep.mubr.msk.f32.mxu0 %vm5498_vm0, %v5499_v11  ;;  %5236 = vmatpush3.bf16.msra.mxu0 %v5235_v36 }
 0x8e7   : > { %5237 = vmatprep.subr.bf16.mxu0 %v5497_v3 }
 0x8ea   : > { %5239 = vmatpush3.bf16.msra.mxu0 %v5238_v39  ;;  %v4475_v39 = vld [vmem:[%s6459_s5 + $0x130] sm:$0xff] }
 0x8eb   : > { %5240 = vmatprep.subr.bf16.mxu0 %v5497_v3 }
 0x9b8   : > { %v1661_v19 = vpop.f32.mrb[12].mxu0 }
 0x9b9   : > { %v1662_v20 = vadd.f32 %v4431_v18, %v1661_v19  ;;  %v4894_v21 = vpop.f32.mrb[13].mxu0  ;;  %v2126_v18 = vld [vmem:[%s6000_s25] sm:$0xff]  ;;  %s533_s25 = sand.u32 1, %s5487_s19  }
 0x9ba   : > { %s4375_s29 = sshll.u32 %s533_s25, 3  ;;  %s4257_s30 = scalar_lea.sflag [#allocation3], %s533_s25 }
 0x9bb   : > { %v1665_v22 = vmax.f32 %v1662_v20, 0.0  ;;  %s535_s2 = scalar_lea.vmem [#allocation2], %s4375_s29  ;;  %s5437_s29 = sshll.u32 %s5500_s22, 4  ;;  %s5438_s29 = int_to_ptr.vmem [resolvable:$false] %s5437_s29 }
 0x9bc   : > { %s4270_s20 = sshll.u32 %s535_s2, 4  ;;  %s6413_s20 = int_to_ptr.vmem [resolvable:$true] %s4270_s20 }
 0x9bd   : > { %4912 = vmatmul.mubr.msk.f32.vlgmr.msra.gmra.mrb[12].mxu1 %vm1681_vm4, %v1665_v22  ;;  %s5433_s17 = scalar_lea.vmem %s6413_s20, 128  ;;  %p5440_p0 = scmp.lt.s32.totalorder %s6413_s20, %s5438_s29 }
 0x9be   : > { %4944 = vmatprep.mubr.msk.f32.mxu1 %vm5498_vm0, %v5499_v11  ;;  %5248 = vmatpush3.bf16.msra.mxu1 %v5247_v9  ;;  %v4491_v9 = vld [vmem:[%s6461_s7 + $0x30] sm:$0xff]  ;;  %p5434_p11 = scmp.ne.s32.totalorder %s6413_s20, %s5433_s17 }
 0x9bf   : > { %5249 = vmatprep.subr.bf16.mxu1 %v5497_v3 }
 0x9c0   : > { %p5435_p12 = pnand %p5434_p11, %p5619_p5 }
 0x9c2   : > { %5251 = vmatpush3.bf16.msra.mxu1 %v5250_v12  ;;  %v5271_v12 = vpack.c.bf16 %v4492_v10, %v4491_v9  ;;  %p5436_p13 = pneg %p5435_p12 }
 0x9c3   : > { %4952 = vmatprep.subr.mxu1 %v5499_v11 }
 0x9c5   : > { %4945 = vmatmul.mubr.msk.f32.vlgmr.msra.gmra.mrb[14].mxu1 %vm570_vm1, %v5938_v55 }
 0x9c6   : > { %4954 = vmatprep.mubr.msk.f32.mxu1 %vm5498_vm0, %v5499_v11 }
 0xa90   : > { %v1751_v24 = vpop.f32.mrb[12].mxu1 }
 0xa91   : > { %v1752_v25 = vadd.f32 %v4433_v23, %v1751_v24  ;;  %v4913_v26 = vpop.f32.mrb[13].mxu1 }
 0xa93   : > { %v1755_v27 = vadd.f32 %v1752_v25, %v1580_v13  ;;  %v6002_v13 = vld [vmem:[%s549_s23] ss:$0 sm:$0xff]  ;;  %s5439_s23 = scalar_lea.vmem %s5438_s29, 256 }
 0xa94   : > { %p5441_p1 = scmp.lt.s32.totalorder %s5439_s23, %s5433_s17 }
 0xa95   : > { %v1760_v28 = vsel %vm570_vm1, %v1755_v27, 0.0 }
 0xa96   : > { %1761 = vadd.xlane.f32.xlu0 %v1760_v28  ;;  %p5442_p2 = por %p5441_p1, %p5440_p0 }
 0xa98   : > { %p5443_p3 = pnand %p5442_p2, %p5436_p13 }
 0xb23   : > { %v1762_v29 = vpop.xlane.xlu0 %1761 }
 0xb24   : > { %v1763_v30 = vmul.f32 0.03125, %v1762_v29  ;;  %v2038_v29 = vpop.f32.mrb[14].mxu1 }
 0xb26   : > { %v1764_v31 = vsub.f32 %v1755_v27, %v1763_v30  ;;  %v4458_v30 = vld [vmem:[%s6460_s6 + $0xa] ss:$0 sm:$0xff] }
 0xb28   : > { %v1765_v32 = vmul.f32 %v1764_v31, %v1764_v31 }
 0xb2a   : > { %v1766_v33 = vsel %vm570_vm1, %v1765_v32, 0.0  ;;  %v2039_v32 = vadd.f32 %v4458_v30, %v2038_v29 }
 0xb2b   : > { %1767 = vadd.xlane.f32.xlu1 %v1766_v33 }
 0xb2c   : > { %4953 = vmatpush3.msra.mxu1 %v2039_v32 }
 0xb2d   : > { %5258 = vmatprep.subr.bf16.mxu1 %v5497_v3 }
 0xbb8   : > { %v1768_v40 = vpop.xlane.xlu1 %1767 }
 0xbb9   : > { %v1769_v41 = vmul.f32 0.03125, %v1768_v40  ;;  %v4476_v40 = vld [vmem:[%s6459_s5 + $0x138] sm:$0xff] }
 0xbbb   : > { %v1770_v42 = vadd.f32 1e-05, %v1769_v41  ;;  %v5262_v41 = vpack.c.bf16 %v4476_v40, %v4475_v39  ;;  %v4504_v39 = vld [vmem:[%s6463_s9 + $0x38] sm:$0xff] }
 0xbbd   : > { %5406 = vrsqrt.f32 %v1770_v42 }
 0xbc7   : > { %v5407_v43 = vpop.eup %5406 }
 0xbc8   : > { %v1772_v45 = vmul.f32 %v5407_v43, %v1764_v31  ;;  %v4946_v31 = vpop.f32.mrb[15].mxu1 }
 0xbca   : > { %v1779_v49 = vmul.f32 %v4437_v44, %v1772_v45  ;;  %v4478_v44 = vld [vmem:[%s6460_s6 + $0x9] ss:$0 sm:$0xff] }
 0xbcc   : > { %v5920_v51 = vadd.f32 %v4438_v48, %v1779_v49 }
 0xbce   : > { %4923 = vmatmul.mubr.msk.f32.vlgmr.msra.gmra.mrb[14].mxu0 %vm570_vm1, %v5920_v51 }
 0xbcf   : > { %5242 = vmatpush3.bf16.msra.mxu0 %v5241_v50  ;;  %4933 = vmatprep.mubr.msk.f32.mxu0 %vm5498_vm0, %v5499_v11  ;;  %v4480_v50 = vld [vmem:[%s6459_s5 + $0x160] sm:$0xff] }
 0xbd0   : > { %5243 = vmatprep.subr.bf16.mxu0 %v5497_v3 }
 0xbd3   : > { %5245 = vmatpush3.bf16.msra.mxu0 %v5244_v54  ;;  %v5265_v54 = vpack.c.bf16 %v4481_v52, %v4480_v50 }
 0xbd4   : > { %4947 = vmatprep.subr.mxu0 %v5499_v11 }
 0xbd6   : > { %4934 = vmatmul.mubr.msk.f32.vlgmr.msra.gmra.mrb[16].mxu0 %vm570_vm1, %v5938_v55 }
 0xbd7   : > { %4949 = vmatprep.mubr.msk.f32.mxu0 %vm5498_vm0, %v5499_v11 }
 0xca1   : > { %v1869_v16 = vpop.f32.mrb[14].mxu0 }
 0xca2   : > { %v4924_v56 = vpop.f32.mrb[15].mxu0  ;;  %v1870_v1 = vadd.f32 %v4444_v61, %v1869_v16  ;;  %v4483_v16 = vld [vmem:[%s6459_s5 + $0x178] sm:$0xff] }
 0xca3   : > { %v5268_v56 = vpack.c.bf16 %v4483_v16, %v4482_v53  ;;  %v4499_v16 = vld [vmem:[%s6467_s13 + $0x2] ss:$0 sm:$0xff] }
 0xca9   : > { %v1955_v58 = vpop.f32.mrb[16].mxu0 }
 0xcaa   : > { %v1956_v62 = vadd.f32 %v4451_v57, %v1955_v58  ;;  %v4935_v63 = vpop.f32.mrb[17].mxu0 }
 0xcac   : > { %4948 = vmatpush3.xpose.msk.msra.mxu0 %vm810_vm2, %v1956_v62 }
 0xcad   : > { %5252 = vmatprep.subr.bf16.mxu0 %v5497_v3 }
 0xcaf   : > { %4950 = vmatmul.mubr.msk.f32.vlgmr.msra.gmra.mrb[18].mxu0 %vm810_vm2, %v1870_v1 }
 0xcb0   : > { %5254 = vmatpush3.bf16.msra.mxu0 %v5253_v0  ;;  %4965 = vmatprep.mubr.msk.f32.mxu0 %vm5498_vm0, %v5499_v11 }
 0xcb1   : > { %5255 = vmatprep.subr.bf16.mxu0 %v5497_v3 }
 0xcb4   : > { %5257 = vmatpush3.bf16.msra.mxu0 %v5256_v5 }
 0xcb5   : > { %5264 = vmatprep.subr.bf16.mxu0 %v5497_v3 }
 0xcb7   : > { %4966 = vmatmul.mubr.msk.f32.vlgmr.msra.gmra.mrb[20].mxu0 %vm570_vm1, %v5920_v51 }
 0xcb8   : > { %4987 = vmatprep.mubr.msk.f32.mxu0 %vm5498_vm0, %v5499_v11  ;;  %5266 = vmatpush3.bf16.msra.mxu0 %v5265_v54 }
 0xcb9   : > { %5267 = vmatprep.subr.bf16.mxu0 %v5497_v3 }
 0xcbc   : > { %5269 = vmatpush3.bf16.msra.mxu0 %v5268_v56 }
 0xcbd   : > { %5270 = vmatprep.subr.bf16.mxu0 %v5497_v3 }
 0xcbf   : > { %4988 = vmatmul.mubr.msk.f32.vlgmr.msra.gmra.mrb[22].mxu0 %vm570_vm1, %v5938_v55 }
 0xcc0   : > { %5004 = vmatprep.mubr.msk.f32.mxu0 %vm5498_vm0, %v5499_v11  ;;  %5272 = vmatpush3.bf16.msra.mxu0 %v5271_v12 }
 0xcc1   : > { %5276 = vmatprep.subr.bf16.mxu0 %v5497_v3 }
 0xd82   : > { %v2114_v14 = vpop.f32.mrb[18].mxu0 }
 0xd83   : > { %v2118_v15 = vmul.f32 0.25, %v2114_v14  ;;  %v4951_v17 = vpop.f32.mrb[19].mxu0  ;;  %v4464_v14 = vld [vmem:[%s6461_s7 + $0x20] sm:$0xff] }
 0xd85   : > { %v2125_v19 = vadd.f32 %v6002_v13, %v2118_v15  ;;  %v4465_v15 = vld [vmem:[%s6461_s7 + $0x28] sm:$0xff] }
 0xd87   : > { %v2127_v20 = vadd.f32 %v2126_v18, %v2125_v19  ;;  %v5274_v18 = vpack.c.bf16 %v4465_v15, %v4464_v14 }
 0xd89   : > { %v2128_v21 = vsel %vm895_vm3, %v2127_v20, -inf }
 0xd8a   : > { %2129 = vmax.xlane.f32.xlu0 %v2128_v21  ;;  %v2294_v22 = vpop.f32.mrb[20].mxu0 }
 0xd8b   : > { %v4967_v23 = vpop.f32.mrb[21].mxu0  ;;  %v2295_v49 = vadd.f32 %v4471_v46, %v2294_v22 }
 0xd92   : > { %v2460_v5 = vpop.f32.mrb[22].mxu0 }
 0xd93   : > { %v4989_v7 = vpop.f32.mrb[23].mxu0  ;;  %v2461_v8 = vadd.f32 %v4485_v6, %v2460_v5 }
 0xe17   : > { %v2130_v24 = vpop.xlane.xlu0 %2129 }
 0xe18   : > { %v2131_v25 = vsub.f32 %v2127_v20, %v2130_v24 }
 0xe1a   : > { %v2132_v26 = vmul.f32 1.442695, %v2131_v25  ;;  %v4496_v25 = vld [vmem:[%s6462_s8 + $0x1] ss:$0 sm:$0xff] }
 0xe1c   : > { %5408 = vpow2.f32 %v2132_v26 }
 0xe26   : > { %v5409_v27 = vpop.eup %5408 }
 0xe27   : > { %v2134_v28 = vsel %vm895_vm3, %v5409_v27, 0.0 }
 0xe28   : > { %2135 = vadd.xlane.f32.xlu1 %v2134_v28 }
 0xeb5   : > { %v2136_v33 = vpop.xlane.xlu1 %2135 }
 0xeb6   : > { %5410 = vrcp.f32 %v2136_v33 }
 0xec0   : > { %v5411_v36 = vpop.eup %5410 }
 0xec1   : > { %v2138_v38 = vmul.f32 %v5411_v36, %v5409_v27  ;;  %v4501_v36 = vld [vmem:[%s6463_s9 + $0x20] sm:$0xff] }
 0xec3   : > { %4955 = vmatmul.mubr.msk.f32.vlgmr.msra.gmra.mrb[16].mxu1 %vm895_vm3, %v2138_v38 }
 0xec4   : > { %5260 = vmatpush3.bf16.msra.mxu1 %v5259_v37  ;;  %4976 = vmatprep.mubr.msk.f32.mxu1 %vm5498_vm0, %v5499_v11  ;;  %v4502_v37 = vld [vmem:[%s6463_s9 + $0x28] sm:$0xff] }
 0xec5   : > { %5261 = vmatprep.subr.bf16.mxu1 %v5497_v3  ;;  %v5277_v38 = vpack.c.bf16 %v4502_v37, %v4501_v36  ;;  %v4531_v36 = vld [vmem:[%s6459_s5 + $0x1c8] sm:$0xff]  ;;  %v4522_v37 = vld [vmem:[%s6468_s14 + $0x3] ss:$0 sm:$0xff] }
 0xec8   : > { %5263 = vmatpush3.bf16.msra.mxu1 %v5262_v41  ;;  %v4508_v41 = vld [vmem:[%s6465_s11 + $0x40] sm:$0xff] }
 0xec9   : > { %4990 = vmatprep.subr.mxu1 %v5499_v11 }
 0xecb   : > { %4977 = vmatmul.mubr.msk.f32.vlgmr.msra.gmra.mrb[18].mxu1 %vm570_vm1, %v5938_v55 }
 0xecc   : > { %4992 = vmatprep.mubr.msk.f32.mxu1 %vm5498_vm0, %v5499_v11 }
 0xf96   : > { %v2208_v42 = vpop.f32.mrb[16].mxu1 }
 0xf97   : > { %v4956_v43 = vpop.f32.mrb[17].mxu1 }
 0xf98   : > { %v4510_v43 = vld [vmem:[%s6465_s11 + $0x50] sm:$0xff] }
 0xf9e   : > { %v2377_v45 = vpop.f32.mrb[18].mxu1 }
 0xf9f   : > { %v2378_v47 = vadd.f32 %v4478_v44, %v2377_v45  ;;  %v4978_v48 = vpop.f32.mrb[19].mxu1  ;;  %v4511_v45 = vld [vmem:[%s6465_s11 + $0x58] sm:$0xff] }
 0xfa0   : > { %v5286_v46 = vpack.c.bf16 %v4511_v45, %v4510_v43  ;;  %v4513_v48 = vld [vmem:[%s6465_s11 + $0x68] sm:$0xff]  ;;  %v4542_v43 = vld [vmem:[%s6460_s6 + $0x10] ss:$0 sm:$0xff] }
 0xfa1   : > { %4991 = vmatpush3.xpose.msk.msra.mxu1 %vm810_vm2, %v2378_v47  ;;  %v4512_v47 = vld [vmem:[%s6465_s11 + $0x60] sm:$0xff] }
 0xfa2   : > { %4995 = vmatprep.subr.mxu1 %v5499_v11 }
 0xfa4   : > { %4993 = vmatmul.mubr.msk.f32.vlgmr.msra.gmra.mrb[20].mxu1 %vm810_vm2, %v2295_v49  ;;  %v5289_v49 = vpack.c.bf16 %v4513_v48, %v4512_v47 }
 0xfa5   : > { %4997 = vmatprep.mubr.msk.f32.mxu1 %vm5498_vm0, %v5499_v11  ;;  %4996 = vmatpush3.msra.mxu1 %v2461_v8 }
 0xfa6   : > { %5273 = vmatprep.subr.bf16.mxu1 %v5497_v3 }
0x1077   : > { %v2536_v57 = vpop.f32.mrb[20].mxu1 }
0x1078   : > { %v2540_v58 = vmul.f32 0.25, %v2536_v57  ;;  %v4994_v59 = vpop.f32.mrb[21].mxu1  ;;  %v4500_v57 = vld [vmem:[%s6468_s14 + $0x2] ss:$0 sm:$0xff] }
0x107a   : > { %v2541_v61 = vadd.f32 %v6002_v13, %v2540_v58 }
0x107c   : > { %v2544_v62 = vadd.f32 %v4489_v60, %v2541_v61  ;;  %v4514_v60 = vld [vmem:[%s6465_s11 + $0x70] sm:$0xff]  ;;  %v4515_v61 = vld [vmem:[%s6465_s11 + $0x78] sm:$0xff] }
0x107e   : > { %v2545_v63 = vsel %vm895_vm3, %v2544_v62, -inf }
0x107f   : > { %2546 = vmax.xlane.f32.xlu0 %v2545_v63  ;;  %v4506_v63 = vld [vmem:[%s6464_s10 + $0x1] ss:$0 sm:$0xff] }
0x110c   : > { %v2547_v0 = vpop.xlane.xlu0 %2546 }
0x110d   : > { %v2548_v1 = vsub.f32 %v2544_v62, %v2547_v0  ;;  %v5292_v62 = vpack.c.bf16 %v4515_v61, %v4514_v60  ;;  %v4552_v60 = vld [vmem:[%s6459_s5 + $0x1b8] sm:$0xff] }
0x110f   : > { %v2549_v2 = vmul.f32 1.442695, %v2548_v1 }
0x1111   : > { %5412 = vpow2.f32 %v2549_v2 }
0x111b   : > { %v5413_v4 = vpop.eup %5412 }
0x111c   : > { %v2551_v55 = vsel %vm895_vm3, %v5413_v4, 0.0 }
0x111d   : > { %2552 = vadd.xlane.f32.xlu1 %v2551_v55  ;;  %v4517_v55 = vld [vmem:[%s6466_s12 + $0x1] ss:$0 sm:$0xff] }
0x11aa   : > { %v2553_v13 = vpop.xlane.xlu1 %2552 }
0x11ab   : > { %5414 = vrcp.f32 %v2553_v13 }
0x11b5   : > { %v5415_v17 = vpop.eup %5414 }
0x11b6   : > { %v2555_v19 = vmul.f32 %v5415_v17, %v5413_v4  ;;  %v4523_v17 = vld [vmem:[%s6459_s5 + $0x180] sm:$0xff] }
0x11b8   : > { %4998 = vmatmul.mubr.msk.f32.vlgmr.msra.gmra.mrb[22].mxu1 %vm895_vm3, %v2555_v19 }
0x11b9   : > { %5275 = vmatpush3.bf16.msra.mxu1 %v5274_v18  ;;  %5011 = vmatprep.mubr.msk.f32.mxu1 %vm5498_vm0, %v5499_v11  ;;  %v4524_v18 = vld [vmem:[%s6459_s5 + $0x188] sm:$0xff] }
0x11ba   : > { %5282 = vmatprep.subr.bf16.mxu1 %v5497_v3  ;;  %v5295_v19 = vpack.c.bf16 %v4524_v18, %v4523_v17 }
0x11bc   : > { %5012 = vmatmul.mubr.msk.f32.vlgmr.msra.gmra.mrb[24].mxu1 %vm810_vm2, %v2208_v42  ;;  %v4509_v42 = vld [vmem:[%s6465_s11 + $0x48] sm:$0xff] }
0x11bd   : > { %5041 = vmatprep.mubr.msk.f32.mxu1 %vm5498_vm0, %v5499_v11  ;;  %v5283_v44 = vpack.c.bf16 %v4509_v42, %v4508_v41  ;;  %v4533_v41 = vld [vmem:[%s6459_s5 + $0x1d8] sm:$0xff] }
0x11bf   : > { %5284 = vmatpush3.bf16.msra.mxu1 %v5283_v44 }
0x11c0   : > { %5285 = vmatprep.subr.bf16.mxu1 %v5497_v3 }
0x11c3   : > { %5287 = vmatpush3.bf16.msra.mxu1 %v5286_v46 }
0x11c4   : > { %5288 = vmatprep.subr.bf16.mxu1 %v5497_v3 }
0x11c7   : > { %5290 = vmatpush3.bf16.msra.mxu1 %v5289_v49  ;;  %v4535_v49 = vld [vmem:[%s6460_s6 + $0xe] ss:$0 sm:$0xff] }
0x11c8   : > { %5291 = vmatprep.subr.bf16.mxu1 %v5497_v3 }
0x11cb   : > { %5293 = vmatpush3.bf16.msra.mxu1 %v5292_v62  ;;  %v4563_v62 = vld [vmem:[%s6459_s5 + $0x220] sm:$0xff] }
0x11cc   : > { %5306 = vmatprep.subr.bf16.mxu1 %v5497_v3 }
0x128b   : > { %v2625_v20 = vpop.f32.mrb[22].mxu1 }
0x128c   : > { %v4999_v21 = vpop.f32.mrb[23].mxu1  ;;  %5005 = vmatmul.mubr.msk.f32.vlgmr.msra.gmra.mrb[24].mxu0 %vm810_vm2, %v2625_v20  ;;  %v4537_v20 = vld [vmem:[%s6459_s5 + $0x200] sm:$0xff] }
0x128d   : > { %5022 = vmatprep.mubr.msk.f32.mxu0 %vm5498_vm0, %v5499_v11  ;;  %5278 = vmatpush3.bf16.msra.mxu0 %v5277_v38  ;;  %v4538_v21 = vld [vmem:[%s6459_s5 + $0x208] sm:$0xff] }
0x128e   : > { %5279 = vmatprep.subr.bf16.mxu0 %v5497_v3 }
0x128f   : > { %v2774_v22 = vpop.f32.mrb[24].mxu1 }
0x1290   : > { %v5013_v23 = vpop.f32.mrb[25].mxu1 }
0x1291   : > { %v4525_v23 = vld [vmem:[%s6459_s5 + $0x190] sm:$0xff] }
0x135f   : > { %v2701_v24 = vpop.f32.mrb[24].mxu0 }
0x1360   : > { %v2775_v26 = vadd.f32 %v2774_v22, %v2701_v24  ;;  %v5006_v27 = vpop.f32.mrb[25].mxu0  ;;  %v5307_v22 = vpack.c.bf16 %v4538_v21, %v4537_v20  ;;  %v4526_v24 = vld [vmem:[%s6459_s5 + $0x198] sm:$0xff] }
0x1361   : > { %v4540_v27 = vld [vmem:[%s6459_s5 + $0x218] sm:$0xff] }
0x1362   : > { %v2786_v28 = vadd.f32 %v4496_v25, %v2775_v26  ;;  %v5298_v25 = vpack.c.bf16 %v4526_v24, %v4525_v23  ;;  %v4539_v26 = vld [vmem:[%s6459_s5 + $0x210] sm:$0xff]  ;;  %v4557_v23 = vld [vmem:[%s6459_s5 + $0x1e8] sm:$0xff] }
0x1364   : > { %v2787_v29 = vadd.f32 %v2786_v28, %v5920_v51  ;;  %v4503_v51 = vld [vmem:[%s6463_s9 + $0x30] sm:$0xff]  ;;  %v5310_v28 = vpack.c.bf16 %v4540_v27, %v4539_v26 }
0x1365   : > { %v5280_v40 = vpack.c.bf16 %v4504_v39, %v4503_v51  ;;  %v4558_v27 = vld [vmem:[%s6459_s5 + $0x1f0] sm:$0xff] }
0x1366   : > { %v2792_v30 = vsel %vm570_vm1, %v2787_v29, 0.0 }
0x1367   : > { %2793 = vadd.xlane.f32.xlu0 %v2792_v30  ;;  %5281 = vmatpush3.bf16.msra.mxu0 %v5280_v40  ;;  %v4532_v40 = vld [vmem:[%s6459_s5 + $0x1d0] sm:$0xff] }
0x1368   : > { %5294 = vmatprep.subr.bf16.mxu0 %v5497_v3  ;;  %v5304_v42 = vpack.c.bf16 %v4533_v41, %v4532_v40 }
0x13f4   : > { %v2794_v31 = vpop.xlane.xlu0 %2793 }
0x13f5   : > { %v2795_v32 = vmul.f32 0.03125, %v2794_v31 }
0x13f7   : > { %v2796_v33 = vsub.f32 %v2787_v29, %v2795_v32 }
0x13f9   : > { %v2797_v34 = vmul.f32 %v2796_v33, %v2796_v33 }
0x13fb   : > { %v2798_v35 = vsel %vm570_vm1, %v2797_v34, 0.0 }
0x13fc   : > { %2799 = vadd.xlane.f32.xlu1 %v2798_v35  ;;  %v4530_v35 = vld [vmem:[%s6459_s5 + $0x1c0] sm:$0xff] }
0x13fd   : > { %v5301_v51 = vpack.c.bf16 %v4531_v36, %v4530_v35 }
0x1489   : > { %v2800_v50 = vpop.xlane.xlu1 %2799 }
0x148a   : > { %v2801_v52 = vmul.f32 0.03125, %v2800_v50 }
0x148c   : > { %v2802_v53 = vadd.f32 1e-05, %v2801_v52  ;;  %v4549_v52 = vld [vmem:[%s6459_s5 + $0x1a0] sm:$0xff] }
0x148e   : > { %5416 = vrsqrt.f32 %v2802_v53  ;;  %v4550_v53 = vld [vmem:[%s6459_s5 + $0x1a8] sm:$0xff] }
0x1498   : > { %v5417_v54 = vpop.eup %5416 }
0x1499   : > { %v2804_v56 = vmul.f32 %v5417_v54, %v2796_v33  ;;  %v4521_v33 = vld [vmem:[%s6467_s13 + $0x3] ss:$0 sm:$0xff]  ;;  %v4528_v54 = vld [vmem:[%s6460_s6 + $0xc] ss:$0 sm:$0xff] }
0x149b   : > { %v2811_v58 = vmul.f32 %v4499_v16, %v2804_v56 }
0x149d   : > { %v2818_v59 = vadd.f32 %v4500_v57, %v2811_v58  ;;  %v5313_v57 = vpack.c.bf16 %v4550_v53, %v4549_v52  ;;  %v4574_v52 = vld [vmem:[%s6461_s7 + $0x58] sm:$0xff] }
0x149f   : > { %5023 = vmatmul.mubr.msk.f32.vlgmr.msra.gmra.mrb[26].mxu0 %vm570_vm1, %v2818_v59 }
0x14a0   : > { %5052 = vmatprep.mubr.msk.f32.mxu0 %vm5498_vm0, %v5499_v11  ;;  %5296 = vmatpush3.bf16.msra.mxu0 %v5295_v19 }
0x14a1   : > { %5297 = vmatprep.subr.bf16.mxu0 %v5497_v3 }
0x14a4   : > { %5299 = vmatpush3.bf16.msra.mxu0 %v5298_v25 }
0x14a5   : > { %5300 = vmatprep.subr.bf16.mxu0 %v5497_v3 }
0x1572   : > { %v2901_v0 = vpop.f32.mrb[26].mxu0 }
0x1573   : > { %v2902_v1 = vadd.f32 %v4506_v63, %v2901_v0  ;;  %v5024_v2 = vpop.f32.mrb[27].mxu0  ;;  %v4564_v63 = vld [vmem:[%s6459_s5 + $0x228] sm:$0xff] }
0x1574   : > { %v5325_v0 = vpack.c.bf16 %v4564_v63, %v4563_v62  ;;  %v4566_v2 = vld [vmem:[%s6459_s5 + $0x238] sm:$0xff] }
0x1575   : > { %v2905_v4 = vmax.f32 %v2902_v1, 0.0  ;;  %v4565_v1 = vld [vmem:[%s6459_s5 + $0x230] sm:$0xff] }
0x1577   : > { %5042 = vmatmul.mubr.msk.f32.vlgmr.msra.gmra.mrb[26].mxu1 %vm1681_vm4, %v2905_v4  ;;  %v5328_v4 = vpack.c.bf16 %v4566_v2, %v4565_v1  ;;  %v4578_v1 = vld [vmem:[%s6462_s8 + $0x2] ss:$0 sm:$0xff] }
0x1578   : > { %5074 = vmatprep.mubr.msk.f32.mxu1 %vm5498_vm0, %v5499_v11  ;;  %5308 = vmatpush3.bf16.msra.mxu1 %v5307_v22  ;;  %v4556_v22 = vld [vmem:[%s6459_s5 + $0x1e0] sm:$0xff] }
0x1579   : > { %5309 = vmatprep.subr.bf16.mxu1 %v5497_v3  ;;  %v5319_v25 = vpack.c.bf16 %v4557_v23, %v4556_v22  ;;  %v4593_v22 = vld [vmem:[%s6465_s11 + $0x98] sm:$0xff] }
0x157c   : > { %5311 = vmatpush3.bf16.msra.mxu1 %v5310_v28  ;;  %v4559_v28 = vld [vmem:[%s6459_s5 + $0x1f8] sm:$0xff] }
0x157d   : > { %5082 = vmatprep.subr.mxu1 %v5499_v11 }
0x164a   : > { %v2992_v5 = vpop.f32.mrb[26].mxu1 }
0x164b   : > { %v2993_v6 = vadd.f32 %v4517_v55, %v2992_v5  ;;  %v5043_v7 = vpop.f32.mrb[27].mxu1 }
0x164c   : > { %v5432_v7 = vld [vmem:[%s5720_s16] ss:$0 sm:$0xff] }
0x164d   : > { %v2996_v8 = vadd.f32 %v2993_v6, %v2818_v59  ;;  %v4551_v59 = vld [vmem:[%s6459_s5 + $0x1b0] sm:$0xff] }
0x164e   : > { %v5316_v61 = vpack.c.bf16 %v4552_v60, %v4551_v59 }
0x164f   : > { %v3001_v9 = vsel %vm570_vm1, %v2996_v8, 0.0 }
0x1650   : > { %3002 = vadd.xlane.f32.xlu0 %v3001_v9 }
0x16dd   : > { %v3003_v10 = vpop.xlane.xlu0 %3002 }
0x16de   : > { %v3004_v12 = vmul.f32 0.03125, %v3003_v10 }
0x16e0   : > { %v3005_v13 = vsub.f32 %v2996_v8, %v3004_v12 }
0x16e2   : > { %v3006_v14 = vmul.f32 %v3005_v13, %v3005_v13 }
0x16e4   : > { %v3007_v15 = vsel %vm570_vm1, %v3006_v14, 0.0 }
0x16e5   : > { %3008 = vadd.xlane.f32.xlu1 %v3007_v15 }
0x1772   : > { %v3009_v29 = vpop.xlane.xlu1 %3008 }
0x1773   : > { %v3010_v30 = vmul.f32 0.03125, %v3009_v29  ;;  %v5322_v29 = vpack.c.bf16 %v4559_v28, %v4558_v27 }
0x1775   : > { %v3011_v31 = vadd.f32 1e-05, %v3010_v30 }
0x1777   : > { %5418 = vrsqrt.f32 %v3011_v31 }
0x1781   : > { %v5419_v32 = vpop.eup %5418 }
0x1782   : > { %v3013_v34 = vmul.f32 %v5419_v32, %v3005_v13  ;;  %v4561_v32 = vld [vmem:[%s6460_s6 + $0xf] ss:$0 sm:$0xff] }
0x1784   : > { %v3020_v38 = vmul.f32 %v4521_v33, %v3013_v34  ;;  %v4554_v34 = vld [vmem:[%s6460_s6 + $0xd] ss:$0 sm:$0xff] }
0x1786   : > { %v6201_v39 = vadd.f32 %v4522_v37, %v3020_v38  ;;  %v4568_v37 = vld [vmem:[%s6460_s6 + $0x11] ss:$0 sm:$0xff] }
0x1788   : > { %5053 = vmatmul.mubr.msk.f32.vlgmr.msra.gmra.mrb[28].mxu0 %vm570_vm1, %v6201_v39  ;;  %5075 = vmatmul.mubr.msk.f32.vlgmr.msra.gmra.mrb[28].mxu1 %vm570_vm1, %v6201_v39 }
0x1789   : > { %5302 = vmatpush3.bf16.msra.mxu0 %v5301_v51  ;;  %5063 = vmatprep.mubr.msk.f32.mxu0 %vm5498_vm0, %v5499_v11 }
0x178a   : > { %5303 = vmatprep.subr.bf16.mxu0 %v5497_v3  ;;  %5084 = vmatprep.mubr.msk.f32.mxu1 %vm5498_vm0, %v5499_v11 }
0x178d   : > { %5305 = vmatpush3.bf16.msra.mxu0 %v5304_v42 }
0x178e   : > { %5077 = vmatprep.subr.mxu0 %v5499_v11 }
0x1790   : > { %5064 = vmatmul.mubr.msk.f32.vlgmr.msra.gmra.mrb[30].mxu0 %vm570_vm1, %v6201_v39 }
0x1791   : > { %5079 = vmatprep.mubr.msk.f32.mxu0 %vm5498_vm0, %v5499_v11 }
0x185b   : > { %v3110_v44 = vpop.f32.mrb[28].mxu0  ;;  %v3276_v45 = vpop.f32.mrb[28].mxu1 }
0x185c   : > { %v3277_v46 = vadd.f32 %v4542_v43, %v3276_v45  ;;  %v5054_v47 = vpop.f32.mrb[29].mxu0  ;;  %v5076_v48 = vpop.f32.mrb[29].mxu1  ;;  %v3111_v58 = vadd.f32 %v4528_v54, %v3110_v44 }
0x185e   : > { %5083 = vmatpush3.msra.mxu1 %v3277_v46 }
0x185f   : > { %5318 = vmatprep.subr.bf16.mxu1 %v5497_v3 }
0x1863   : > { %v3193_v50 = vpop.f32.mrb[30].mxu0 }
0x1864   : > { %v3194_v16 = vadd.f32 %v4535_v49, %v3193_v50  ;;  %v5065_v56 = vpop.f32.mrb[31].mxu0  ;;  %v4573_v50 = vld [vmem:[%s6461_s7 + $0x50] sm:$0xff] }
0x1865   : > { %v5331_v53 = vpack.c.bf16 %v4574_v52, %v4573_v50  ;;  %v4548_v56 = vld [vmem:[%s6461_s7 + $0x48] sm:$0xff] }
0x1866   : > { %5078 = vmatpush3.xpose.msk.msra.mxu0 %vm810_vm2, %v3194_v16  ;;  %v4547_v16 = vld [vmem:[%s6461_s7 + $0x40] sm:$0xff] }
0x1867   : > { %5312 = vmatprep.subr.bf16.mxu0 %v5497_v3 }
0x1869   : > { %5080 = vmatmul.mubr.msk.f32.vlgmr.msra.gmra.mrb[32].mxu0 %vm810_vm2, %v3111_v58  ;;  %v5334_v58 = vpack.c.bf16 %v4548_v56, %v4547_v16 }
0x186a   : > { %5314 = vmatpush3.bf16.msra.mxu0 %v5313_v57  ;;  %5095 = vmatprep.mubr.msk.f32.mxu0 %vm5498_vm0, %v5499_v11 }
0x186b   : > { %5315 = vmatprep.subr.bf16.mxu0 %v5497_v3 }
0x186e   : > { %5317 = vmatpush3.bf16.msra.mxu0 %v5316_v61 }
0x186f   : > { %5324 = vmatprep.subr.bf16.mxu0 %v5497_v3 }
0x1871   : > { %5096 = vmatmul.mubr.msk.f32.vlgmr.msra.gmra.mrb[34].mxu0 %vm570_vm1, %v6201_v39 }
0x1872   : > { %5326 = vmatpush3.bf16.msra.mxu0 %v5325_v0  ;;  %5117 = vmatprep.mubr.msk.f32.mxu0 %vm5498_vm0, %v5499_v11 }
0x1873   : > { %5327 = vmatprep.subr.bf16.mxu0 %v5497_v3 }
0x1876   : > { %5329 = vmatpush3.bf16.msra.mxu0 %v5328_v4 }
0x1877   : > { %5330 = vmatprep.subr.bf16.mxu0 %v5497_v3 }
0x1879   : > { %5118 = vmatmul.mubr.msk.f32.vlgmr.msra.gmra.mrb[36].mxu0 %vm570_vm1, %v6201_v39 }
0x187a   : > { %5134 = vmatprep.mubr.msk.f32.mxu0 %vm5498_vm0, %v5499_v11  ;;  %5332 = vmatpush3.bf16.msra.mxu0 %v5331_v53 }
0x187b   : > { %5336 = vmatprep.subr.bf16.mxu0 %v5497_v3 }
0x193c   : > { %v3352_v55 = vpop.f32.mrb[32].mxu0 }
0x193d   : > { %v3356_v5 = vmul.f32 0.25, %v3352_v55  ;;  %v5081_v6 = vpop.f32.mrb[33].mxu0 }
0x193f   : > { %v3357_v8 = vadd.f32 %v5432_v7, %v3356_v5 }
0x1941   : > { %v3358_v9 = vsel %vm895_vm3, %v3357_v8, -inf }
0x1942   : > { %3359 = vmax.xlane.f32.xlu0 %v3358_v9 }
0x1944   : > { %v3524_v10 = vpop.f32.mrb[34].mxu0 }
0x1945   : > { %v5097_v12 = vpop.f32.mrb[35].mxu0  ;;  %v3525_v38 = vadd.f32 %v4554_v34, %v3524_v10 }
0x1946   : > { %v4583_v12 = vld [vmem:[%s6463_s9 + $0x40] sm:$0xff] }
0x194c   : > { %v3690_v13 = vpop.f32.mrb[36].mxu0 }
0x194d   : > { %v5119_v14 = vpop.f32.mrb[37].mxu0  ;;  %v3691_v51 = vadd.f32 %v4568_v37, %v3690_v13  ;;  %v4584_v13 = vld [vmem:[%s6463_s9 + $0x48] sm:$0xff] }
0x194e   : > { %v5337_v14 = vpack.c.bf16 %v4584_v13, %v4583_v12 }
0x19cf   : > { %v3360_v15 = vpop.xlane.xlu0 %3359 }
0x19d0   : > { %v3361_v17 = vsub.f32 %v3357_v8, %v3360_v15  ;;  %v4586_v15 = vld [vmem:[%s6463_s9 + $0x58] sm:$0xff] }
0x19d2   : > { %v3362_v18 = vmul.f32 1.442695, %v3361_v17 }
0x19d4   : > { %5420 = vpow2.f32 %v3362_v18  ;;  %v4590_v18 = vld [vmem:[%s6465_s11 + $0x80] sm:$0xff] }
0x19de   : > { %v5421_v19 = vpop.eup %5420 }
0x19df   : > { %v3364_v20 = vsel %vm895_vm3, %v5421_v19, 0.0 }
0x19e0   : > { %3365 = vadd.xlane.f32.xlu1 %v3364_v20  ;;  %v4592_v20 = vld [vmem:[%s6465_s11 + $0x90] sm:$0xff] }
0x19e1   : > { %v5346_v23 = vpack.c.bf16 %v4593_v22, %v4592_v20 }
0x1a6d   : > { %v3366_v21 = vpop.xlane.xlu1 %3365 }
0x1a6e   : > { %5422 = vrcp.f32 %v3366_v21 }
0x1a78   : > { %v5423_v24 = vpop.eup %5422 }
0x1a79   : > { %v3368_v26 = vmul.f32 %v5423_v24, %v5421_v19  ;;  %v4591_v19 = vld [vmem:[%s6465_s11 + $0x88] sm:$0xff]  ;;  %v4594_v24 = vld [vmem:[%s6465_s11 + $0xa0] sm:$0xff] }
0x1a7a   : > { %v5343_v21 = vpack.c.bf16 %v4591_v19, %v4590_v18 }
0x1a7b   : > { %5085 = vmatmul.mubr.msk.f32.vlgmr.msra.gmra.mrb[30].mxu1 %vm895_vm3, %v3368_v26 }
0x1a7c   : > { %5320 = vmatpush3.bf16.msra.mxu1 %v5319_v25  ;;  %5106 = vmatprep.mubr.msk.f32.mxu1 %vm5498_vm0, %v5499_v11  ;;  %v4595_v25 = vld [vmem:[%s6465_s11 + $0xa8] sm:$0xff] }
0x1a7d   : > { %5321 = vmatprep.subr.bf16.mxu1 %v5497_v3  ;;  %v5349_v26 = vpack.c.bf16 %v4595_v25, %v4594_v24 }
0x1a80   : > { %5323 = vmatpush3.bf16.msra.mxu1 %v5322_v29 }
0x1a81   : > { %5120 = vmatprep.subr.mxu1 %v5499_v11 }
0x1a83   : > { %5107 = vmatmul.mubr.msk.f32.vlgmr.msra.gmra.mrb[32].mxu1 %vm570_vm1, %v6201_v39 }
0x1a84   : > { %5122 = vmatprep.mubr.msk.f32.mxu1 %vm5498_vm0, %v5499_v11 }
0x1b4e   : > { %v3438_v30 = vpop.f32.mrb[30].mxu1 }
0x1b4f   : > { %v5086_v31 = vpop.f32.mrb[31].mxu1 }
0x1b50   : > { %v4581_v31 = vld [vmem:[%s6467_s13 + $0x4] ss:$0 sm:$0xff] }
0x1b56   : > { %v3607_v33 = vpop.f32.mrb[32].mxu1 }
0x1b57   : > { %v3608_v35 = vadd.f32 %v4561_v32, %v3607_v33  ;;  %v5108_v36 = vpop.f32.mrb[33].mxu1  ;;  %v4582_v33 = vld [vmem:[%s6468_s14 + $0x4] ss:$0 sm:$0xff] }
0x1b58   : > { %v4597_v36 = vld [vmem:[%s6465_s11 + $0xb8] sm:$0xff] }
0x1b59   : > { %5121 = vmatpush3.xpose.msk.msra.mxu1 %vm810_vm2, %v3608_v35 }
0x1b5a   : > { %5125 = vmatprep.subr.mxu1 %v5499_v11 }
0x1b5c   : > { %5123 = vmatmul.mubr.msk.f32.vlgmr.msra.gmra.mrb[34].mxu1 %vm810_vm2, %v3525_v38  ;;  %v4588_v38 = vld [vmem:[%s6464_s10 + $0x2] ss:$0 sm:$0xff] }
0x1b5d   : > { %5126 = vmatpush3.msra.mxu1 %v3691_v51  ;;  %5127 = vmatprep.mubr.msk.f32.mxu1 %vm5498_vm0, %v5499_v11 }
0x1b5e   : > { %5333 = vmatprep.subr.bf16.mxu1 %v5497_v3 }
0x1c2f   : > { %v3766_v40 = vpop.f32.mrb[34].mxu1 }
0x1c30   : > { %v3770_v41 = vmul.f32 0.25, %v3766_v40  ;;  %v5124_v42 = vpop.f32.mrb[35].mxu1 }
0x1c32   : > { %v3771_v43 = vadd.f32 %v5432_v7, %v3770_v41 }
0x1c34   : > { %v3772_v44 = vsel %vm895_vm3, %v3771_v43, -inf }
0x1c35   : > { %3773 = vmax.xlane.f32.xlu0 %v3772_v44 }
0x1cc2   : > { %v3774_v45 = vpop.xlane.xlu0 %3773 }
0x1cc3   : > { %v3775_v46 = vsub.f32 %v3771_v43, %v3774_v45  ;;  %v4599_v43 = vld [vmem:[%s6466_s12 + $0x2] ss:$0 sm:$0xff] }
0x1cc5   : > { %v3776_v47 = vmul.f32 1.442695, %v3775_v46 }
0x1cc7   : > { %5424 = vpow2.f32 %v3776_v47 }
0x1cd1   : > { %v5425_v48 = vpop.eup %5424 }
0x1cd2   : > { %v3778_v49 = vsel %vm895_vm3, %v5425_v48, 0.0 }
0x1cd3   : > { %3779 = vadd.xlane.f32.xlu1 %v3778_v49 }
0x1d60   : > { %v3780_v54 = vpop.xlane.xlu1 %3779 }
0x1d61   : > { %5426 = vrcp.f32 %v3780_v54 }
0x1d6b   : > { %v5427_v57 = vpop.eup %5426 }
0x1d6c   : > { %v3782_v59 = vmul.f32 %v5427_v57, %v5425_v48 }
0x1d6e   : > { %5128 = vmatmul.mubr.msk.f32.vlgmr.msra.gmra.mrb[36].mxu1 %vm895_vm3, %v3782_v59  ;;  %v4603_v59 = vld [vmem:[%s6467_s13 + $0x5] ss:$0 sm:$0xff] }
0x1d6f   : > { %5335 = vmatpush3.bf16.msra.mxu1 %v5334_v58  ;;  %5141 = vmatprep.mubr.msk.f32.mxu1 %vm5498_vm0, %v5499_v11 }
0x1d70   : > { %5342 = vmatprep.subr.bf16.mxu1 %v5497_v3 }
0x1d72   : > { %5142 = vmatmul.mubr.msk.f32.vlgmr.msra.gmra.mrb[38].mxu1 %vm810_vm2, %v3438_v30 }
0x1d73   : > { %5171 = vmatprep.mubr.msk.f32.mxu1 %vm5498_vm0, %v5499_v11  ;;  %5344 = vmatpush3.bf16.msra.mxu1 %v5343_v21 }
0x1d74   : > { %5345 = vmatprep.subr.bf16.mxu1 %v5497_v3 }
0x1d77   : > { %5347 = vmatpush3.bf16.msra.mxu1 %v5346_v23 }
0x1d78   : > { %5348 = vmatprep.subr.bf16.mxu1 %v5497_v3 }
0x1d7b   : > { %5350 = vmatpush3.bf16.msra.mxu1 %v5349_v26 }
0x1d7c   : > { %5351 = vmatprep.subr.bf16.mxu1 %v5497_v3 }
0x1e41   : > { %v3852_v60 = vpop.f32.mrb[36].mxu1 }
0x1e42   : > { %v5129_v61 = vpop.f32.mrb[37].mxu1  ;;  %5135 = vmatmul.mubr.msk.f32.vlgmr.msra.gmra.mrb[38].mxu0 %vm810_vm2, %v3852_v60 }
0x1e43   : > { %5152 = vmatprep.mubr.msk.f32.mxu0 %vm5498_vm0, %v5499_v11  ;;  %5338 = vmatpush3.bf16.msra.mxu0 %v5337_v14  ;;  %v4604_v61 = vld [vmem:[%s6468_s14 + $0x5] ss:$0 sm:$0xff] }
0x1e44   : > { %5339 = vmatprep.subr.bf16.mxu0 %v5497_v3  ;;  %v4596_v3 = vld [vmem:[%s6465_s11 + $0xb0] sm:$0xff] }
0x1e45   : > { %v4001_v62 = vpop.f32.mrb[38].mxu1  ;;  %v5352_v37 = vpack.c.bf16 %v4597_v36, %v4596_v3 }
0x1e46   : > { %v5143_v63 = vpop.f32.mrb[39].mxu1 }
0x1e47   : > { %5353 = vmatpush3.bf16.msra.mxu1 %v5352_v37 }
0x1f15   : > { %v3928_v0 = vpop.f32.mrb[38].mxu0 }
0x1f16   : > { %v4002_v2 = vadd.f32 %v4001_v62, %v3928_v0  ;;  %v5136_v4 = vpop.f32.mrb[39].mxu0 }
0x1f18   : > { %v4013_v55 = vadd.f32 %v4578_v1, %v4002_v2 }
0x1f1a   : > { %v4014_v5 = vadd.f32 %v4013_v55, %v6201_v39  ;;  %v4585_v39 = vld [vmem:[%s6463_s9 + $0x50] sm:$0xff] }
0x1f1b   : > { %v5340_v17 = vpack.c.bf16 %v4586_v15, %v4585_v39 }
0x1f1c   : > { %v4019_v6 = vsel %vm570_vm1, %v4014_v5, 0.0 }
0x1f1d   : > { %4020 = vadd.xlane.f32.xlu0 %v4019_v6  ;;  %5341 = vmatpush3.bf16.msra.mxu0 %v5340_v17 }
0x1faa   : > { %v4021_v7 = vpop.xlane.xlu0 %4020 }
0x1fab   : > { %v4022_v8 = vmul.f32 0.03125, %v4021_v7 }
0x1fad   : > { %v4023_v9 = vsub.f32 %v4014_v5, %v4022_v8 }
0x1faf   : > { %v4024_v10 = vmul.f32 %v4023_v9, %v4023_v9 }
0x1fb1   : > { %v4025_v11 = vsel %vm570_vm1, %v4024_v10, 0.0 }
0x1fb2   : > { %4026 = vadd.xlane.f32.xlu1 %v4025_v11 }
0x203f   : > { %v4027_v27 = vpop.xlane.xlu1 %4026 }
0x2040   : > { %v4028_v28 = vmul.f32 0.03125, %v4027_v27 }
0x2042   : > { %v4029_v29 = vadd.f32 1e-05, %v4028_v28 }
0x2044   : > { %5428 = vrsqrt.f32 %v4029_v29 }
0x204e   : > { %v5429_v30 = vpop.eup %5428 }
0x204f   : > { %v4031_v32 = vmul.f32 %v5429_v30, %v4023_v9 }
0x2051   : > { %v4038_v34 = vmul.f32 %v4581_v31, %v4031_v32 }
0x2053   : > { %v4045_v35 = vadd.f32 %v4582_v33, %v4038_v34 }
0x2055   : > { %5153 = vmatmul.mubr.msk.f32.vlgmr.msra.gmra.mrb[40].mxu0 %vm570_vm1, %v4045_v35 }
0x2128   : > { %v4128_v51 = vpop.f32.mrb[40].mxu0 }
0x2129   : > { %v4129_v40 = vadd.f32 %v4588_v38, %v4128_v51  ;;  %v5154_v41 = vpop.f32.mrb[41].mxu0 }
0x212b   : > { %v4132_v42 = vmax.f32 %v4129_v40, 0.0 }
0x212d   : > { %5172 = vmatmul.mubr.msk.f32.vlgmr.msra.gmra.mrb[40].mxu1 %vm1681_vm4, %v4132_v42 }
0x2200   : > { %v4219_v44 = vpop.f32.mrb[40].mxu1 }
0x2201   : > { %v4220_v45 = vadd.f32 %v4599_v43, %v4219_v44  ;;  %v5173_v46 = vpop.f32.mrb[41].mxu1 }
0x2203   : > { %v4223_v47 = vadd.f32 %v4220_v45, %v4045_v35 }
0x2205   : > { %v4228_v48 = vsel %vm570_vm1, %v4223_v47, 0.0 }
0x2206   : > { %4229 = vadd.xlane.f32.xlu0 %v4228_v48 }
0x2293   : > { %v4230_v49 = vpop.xlane.xlu0 %4229 }
0x2294   : > { %v4231_v50 = vmul.f32 0.03125, %v4230_v49 }
0x2296   : > { %v4232_v52 = vsub.f32 %v4223_v47, %v4231_v50 }
0x2298   : > { %v4233_v53 = vmul.f32 %v4232_v52, %v4232_v52 }
0x229a   : > { %v4234_v54 = vsel %vm570_vm1, %v4233_v53, 0.0 }
0x229b   : > { %4235 = vadd.xlane.f32.xlu1 %v4234_v54 }
0x2328   : > { %v4236_v16 = vpop.xlane.xlu1 %4235 }
0x2329   : > { %v4237_v56 = vmul.f32 0.03125, %v4236_v16 }
0x232b   : > { %v4238_v57 = vadd.f32 1e-05, %v4237_v56 }
0x232d   : > { %5430 = vrsqrt.f32 %v4238_v57 }
0x2337   : > { %v5431_v58 = vpop.eup %5430 }
0x2338   : > { %v4240_v60 = vmul.f32 %v5431_v58, %v4232_v52 }
0x233a   : > { %v4247_v62 = vmul.f32 %v4603_v59, %v4240_v60 }
0x233c   : > { %v4254_v63 = vadd.f32 %v4604_v61, %v4247_v62 }
0x233e   : > { %4255 = vst.msk [vmem:[%s535_s2] sm:$0xff] %vm570_vm1, %v4254_v63 }
0x233f   : > { %5446 = shalt.err (!%p5443_p3)
}
0x2340   : > { %s5447_s25 = scalar_lea.hbm %s6411_s27, 128  ;;  %s5451_s2 = scalar_lea.hbm %s6469_s15, 256 }
0x2341   : > { %p5448_p4 = scmp.ne.s32.totalorder %s6411_s27, %s5447_s25  ;;  %p5452_p9 = scmp.lt.u32.totalorder %s6411_s27, %s6469_s15 }
0x2342   : > { %p5453_p10 = scmp.lt.u32.totalorder %s5451_s2, %s5447_s25  ;;  %p5455_p12 = scmp.lt.u32.totalorder %s5447_s25, %s6411_s27 }
0x2343   : > { %p5449_p7 = pnand %p5448_p4, %p5619_p5 }
0x2344   : > { %p5454_p11 = por %p5453_p10, %p5452_p9 }
0x2345   : > { %p5450_p8 = pneg %p5449_p7 }
0x2346   : > { %p5456_p13 = por %p5455_p12, %p5454_p11 }
0x2348   : > { %p5457_p0 = pnand %p5456_p13, %p5450_p8 }
0x234a   : > { %5460 = shalt.err (!%p5457_p0)
}
0x234b   : > { %5354 = dma.vmem_to_hbm [thread:$0]  (%p5619_p5), %s6413_s20, 128, %s6411_s27, %s4257_s30  }
0x234c PF: > { %p5360_p1 = scmp.ge.s32.totalorder %s5495_s21, 2  ;;  %s4282_s22 = sand.u32 1, %s5483_s18  }
0x234d   : > { %s4283_s29 = scalar_lea.sflag [#allocation3], %s4282_s22 }
0x234e   : > { %p5357_p2 = pnand %p5360_p1, %p5623_p6 }
0x2350   : > { %5478 = dma.done.wait (!%p5357_p2), %s4283_s29, 128  }
0x2351   : > { %5480 = vsyncadd (!%p5357_p2), %s4283_s29, 4294967168  ;;  %s6487_s21 = sld [smem:[#allocation6_spill]]  ;;  %s6488_s23 = sld [smem:[#allocation5_spill]] }
0x2352   : > { %s6489_s20 = sld [smem:[#allocation7_spill]]  ;;  %s6490_s18 = smov %s5487_s19 }
0x2357   : > { %p25_p3 = scmp.ge.s32.totalorder %s6487_s21, 4   ;;  %s6491_s19 = smov %s6488_s23 }
0x2359   :  { %27 = sbr.rel (!%p25_p3) target bundleno = 6 (0x6), region = 187 }
0x2360   :  { %4288 = vsyncpa [#allocation3], 1 }
0x2361   :  { %4290 = vsyncpa [#allocation3 + $0x1], 1 }

</bundles_post_ra>
